<compile_context>
chip_gen: v7x
topology: tpu7x:2x2x1
jax: 0.10.0
libtpu: 0.0.40
codegen_flags: <defaults>
</compile_context>

<pallas_src>
import functools

import jax
import jax.numpy as jnp
from jax.experimental import pallas as pl
from jax.experimental.pallas import tpu as pltpu


# ----------------------------------------------------------------------------- #
# Model configuration (tiny deterministic LM that ModelLogits wraps)
# ----------------------------------------------------------------------------- #
VOCAB = 256
HIDDEN = 32
N_HEADS = 2
HEAD_DIM = HIDDEN // N_HEADS
MLP_DIM = 4 * HIDDEN
N_LAYERS = 2
MAX_SEQ = 8
DTYPE = jnp.bfloat16            # stands in for torch .half() on TPU
LN_EPS = 1e-5
PARAMS_PER_LAYER = 10           # ln1_g, ln1_b, wqkv, wo, ln2_g, ln2_b, w1, b1, w2, b2


# ----------------------------------------------------------------------------- #
# In-kernel helpers (all f32 math on VPU/EUP; matmuls feed bf16 to the MXU)
# ----------------------------------------------------------------------------- #
def _layernorm_f32(x, g, b, eps):
    mu = jnp.mean(x, axis=-1, keepdims=True)
    xc = x - mu
    var = jnp.mean(xc * xc, axis=-1, keepdims=True)
    return xc * jax.lax.rsqrt(var + eps) * g + b


def _gelu_tanh_f32(x):
    # tanh-approx GELU (same as the previous version / jax.nn.gelu default).
    # TODO(synk): PyTorch nn.GELU defaults to exact erf; use erf if bit-parity matters.
    c = 0.7978845608028654  # sqrt(2/pi)
    return 0.5 * x * (1.0 + jnp.tanh(c * (x + 0.044715 * x * x * x)))


# ----------------------------------------------------------------------------- #
# Single fused Pallas kernel: whole transformer stack + lm_head for one batch row
# ----------------------------------------------------------------------------- #
def _fused_model_kernel(*refs, n_layers, n_heads, head_dim, eps, scale):
    # refs layout: [x] + n_layers * [ln1_g, ln1_b, wqkv, wo, ln2_g, ln2_b, w1, b1, w2, b2]
    #              + [ln_f_g, ln_f_b, lm_head] + [o]
    x_ref = refs[0]
    o_ref = refs[-1]
    w = refs[1:-1]

    S = x_ref.shape[1]
    H = x_ref.shape[2]

    # Residual stream lives in f32 registers/VMEM for the whole forward.
    x = x_ref[0].astype(jnp.float32)                       # (S, H)

    row = jax.lax.broadcasted_iota(jnp.int32, (S, S), 0)
    col = jax.lax.broadcasted_iota(jnp.int32, (S, S), 1)
    causal = col <= row

    p = 0
    for _ in range(n_layers):
        ln1_g = w[p + 0][...].astype(jnp.float32)
        ln1_b = w[p + 1][...].astype(jnp.float32)
        wqkv = w[p + 2][...]                               # (H, 3H) bf16
        wo = w[p + 3][...]                                 # (H, H) bf16
        ln2_g = w[p + 4][...].astype(jnp.float32)
        ln2_b = w[p + 5][...].astype(jnp.float32)
        w1 = w[p + 6][...]                                 # (H, MLP) bf16
        b1 = w[p + 7][...].astype(jnp.float32)             # (1, MLP)
        w2 = w[p + 8][...]                                 # (MLP, H) bf16
        b2 = w[p + 9][...].astype(jnp.float32)             # (1, H)
        p += PARAMS_PER_LAYER

        # ---- attention block (LN prologue + fused QKV + per-head softmax) ----
        h = _layernorm_f32(x, ln1_g, ln1_b, eps).astype(jnp.bfloat16)
        qkv = jnp.dot(h, wqkv, preferred_element_type=jnp.float32)   # (S, 3H) f32

        attn_out = jnp.zeros((S, H), jnp.float32)
        for hh in range(n_heads):
            lo = hh * head_dim
            hi = (hh + 1) * head_dim
            q = qkv[:, 0 * H + lo: 0 * H + hi].astype(jnp.bfloat16)  # (S, D)
            k = qkv[:, 1 * H + lo: 1 * H + hi].astype(jnp.bfloat16)
            v = qkv[:, 2 * H + lo: 2 * H + hi].astype(jnp.bfloat16)

            s = jax.lax.dot_general(
                q, k, (((1,), (1,)), ((), ())),
                preferred_element_type=jnp.float32) * scale          # (S, S) f32
            s = jnp.where(causal, s, jnp.float32(-1e30))             # causal mask
            s = s - jnp.max(s, axis=-1, keepdims=True)
            pr = jnp.exp(s)
            pr = pr * pl.reciprocal(jnp.sum(pr, axis=-1, keepdims=True), approx=True)

            o_h = jnp.dot(pr.astype(jnp.bfloat16), v,
                          preferred_element_type=jnp.float32)        # (S, D) f32
            # concat(o_h) @ wo  ==  sum_h  o_h @ wo[h*D:(h+1)*D, :]
            attn_out = attn_out + jnp.dot(
                o_h.astype(jnp.bfloat16), wo[lo:hi, :],
                preferred_element_type=jnp.float32)                  # (S, H) f32

        x = x + attn_out                                             # residual (f32)

        # ---- MLP block (LN prologue, bias+gelu fused in epilogue) ----
        h2 = _layernorm_f32(x, ln2_g, ln2_b, eps).astype(jnp.bfloat16)
        m = jnp.dot(h2, w1, preferred_element_type=jnp.float32) + b1
        m = _gelu_tanh_f32(m).astype(jnp.bfloat16)
        x = x + jnp.dot(m, w2, preferred_element_type=jnp.float32) + b2

    # ---- final LN + vocab projection (lane-dense [S, V] store) ----
    ln_f_g = w[p + 0][...].astype(jnp.float32)
    ln_f_b = w[p + 1][...].astype(jnp.float32)
    lm_head = w[p + 2][...]                                          # (H, V) bf16
    hf = _layernorm_f32(x, ln_f_g, ln_f_b, eps).astype(jnp.bfloat16)
    o_ref[0] = jnp.dot(hf, lm_head,
                       preferred_element_type=jnp.float32).astype(o_ref.dtype)


# ----------------------------------------------------------------------------- #
# Parameters & wrappers
# ----------------------------------------------------------------------------- #
def init_params(key):
    def normal(k, shape, std=0.02):
        return (std * jax.random.normal(k, shape, dtype=jnp.float32)).astype(DTYPE)

    keys = jax.random.split(key, 4 + N_LAYERS)
    params = {
        "tok_emb": normal(keys[0], (VOCAB, HIDDEN)),
        "pos_emb": normal(keys[1], (MAX_SEQ, HIDDEN)),
        "ln_f_g": jnp.ones((HIDDEN,), DTYPE),
        "ln_f_b": jnp.zeros((HIDDEN,), DTYPE),
        "lm_head": normal(keys[2], (HIDDEN, VOCAB)),
        "layers": [],
    }
    for l in range(N_LAYERS):
        lk = jax.random.split(keys[4 + l], 8)
        params["layers"].append(
            {
                "ln1_g": jnp.ones((HIDDEN,), DTYPE),
                "ln1_b": jnp.zeros((HIDDEN,), DTYPE),
                "wqkv": normal(lk[0], (HIDDEN, 3 * HIDDEN)),   # fused Q|K|V weight
                "wo": normal(lk[3], (HIDDEN, HIDDEN)),
                "ln2_g": jnp.ones((HIDDEN,), DTYPE),
                "ln2_b": jnp.zeros((HIDDEN,), DTYPE),
                "w1": normal(lk[4], (HIDDEN, MLP_DIM)),
                "b1": jnp.zeros((MLP_DIM,), DTYPE),
                "w2": normal(lk[5], (MLP_DIM, HIDDEN)),
                "b2": jnp.zeros((HIDDEN,), DTYPE),
            }
        )
    return params


def _flatten_params(params):
    H = HIDDEN
    flat = []
    for lp in params["layers"]:
        flat += [
            lp["ln1_g"].reshape(1, H), lp["ln1_b"].reshape(1, H),
            lp["wqkv"], lp["wo"],
            lp["ln2_g"].reshape(1, H), lp["ln2_b"].reshape(1, H),
            lp["w1"], lp["b1"].reshape(1, MLP_DIM),
            lp["w2"], lp["b2"].reshape(1, H),
        ]
    flat += [params["ln_f_g"].reshape(1, H),
             params["ln_f_b"].reshape(1, H),
             params["lm_head"]]
    return flat


@jax.jit
def model_logits_forward(params, input_ids):
    """Equivalent of ModelLogits.forward: input_ids [B, S] int32 -> logits [B, S, V]."""
    B, S = input_ids.shape

    # Embedding lookup (data-dependent gather; plain-JAX glue, not a Pallas hot path).
    x = (params["tok_emb"][input_ids] + params["pos_emb"][:S][None, :, :]).astype(DTYPE)

    flat = _flatten_params(params)

    def full_spec(a):
        # All parameters are 2-D and loaded whole; constant block across the batch grid.
        return pl.BlockSpec(a.shape, lambda b: (0, 0))

    kernel = functools.partial(
        _fused_model_kernel,
        n_layers=N_LAYERS, n_heads=N_HEADS, head_dim=HEAD_DIM,
        eps=LN_EPS, scale=1.0 / float(HEAD_DIM) ** 0.5)

    return pl.pallas_call(
        kernel,
        out_shape=jax.ShapeDtypeStruct((B, S, VOCAB), DTYPE),
        grid=(B,),
        in_specs=[pl.BlockSpec((1, S, HIDDEN), lambda b: (b, 0, 0))]
        + [full_spec(a) for a in flat],
        out_specs=pl.BlockSpec((1, S, VOCAB), lambda b: (b, 0, 0)),
        compiler_params=pltpu.CompilerParams(dimension_semantics=("parallel",)),
    )(x, *flat)


# ----------------------------------------------------------------------------- #
# Pure-JAX reference (same math / same bf16 cast points) for a correctness check
# ----------------------------------------------------------------------------- #
def model_logits_reference(params, input_ids):
    B, S = input_ids.shape
    H, HD = HIDDEN, HEAD_DIM
    scale = 1.0 / float(HD) ** 0.5

    x = (params["tok_emb"][input_ids] + params["pos_emb"][:S][None, :, :]).astype(DTYPE)
    x = x.astype(jnp.float32)

    def ln(xx, g, b):
        mu = jnp.mean(xx, -1, keepdims=True)
        xc = xx - mu
        var = jnp.mean(xc * xc, -1, keepdims=True)
        return xc * jax.lax.rsqrt(var + LN_EPS) * g.astype(jnp.float32) + b.astype(jnp.float32)

    row = jax.lax.broadcasted_iota(jnp.int32, (S, S), 0)
    col = jax.lax.broadcasted_iota(jnp.int32, (S, S), 1)
    causal = col <= row

    for lp in params["layers"]:
        h = ln(x, lp["ln1_g"], lp["ln1_b"]).astype(DTYPE)
        qkv = jnp.einsum("bsh,hk->bsk", h, lp["wqkv"], preferred_element_type=jnp.float32)
        attn_out = jnp.zeros((B, S, H), jnp.float32)
        for hh in range(N_HEADS):
            lo, hi = hh * HD, (hh + 1) * HD
            q = qkv[..., 0 * H + lo: 0 * H + hi].astype(DTYPE)
            k = qkv[..., 1 * H + lo: 1 * H + hi].astype(DTYPE)
            v = qkv[..., 2 * H + lo: 2 * H + hi].astype(DTYPE)
            s = jnp.einsum("bqd,bkd->bqk", q, k, preferred_element_type=jnp.float32) * scale
            s = jnp.where(causal, s, jnp.float32(-1e30))
            s = s - jnp.max(s, -1, keepdims=True)
            pr = jnp.exp(s)
            pr = pr / jnp.sum(pr, -1, keepdims=True)
            o_h = jnp.einsum("bqk,bkd->bqd", pr.astype(DTYPE), v,
                             preferred_element_type=jnp.float32)
            attn_out = attn_out + jnp.einsum(
                "bqd,dh->bqh", o_h.astype(DTYPE), lp["wo"][lo:hi, :],
                preferred_element_type=jnp.float32)
        x = x + attn_out

        h2 = ln(x, lp["ln2_g"], lp["ln2_b"]).astype(DTYPE)
        m = jnp.einsum("bsh,hk->bsk", h2, lp["w1"],
                       preferred_element_type=jnp.float32) + lp["b1"].astype(jnp.float32)
        m = _gelu_tanh_f32(m).astype(DTYPE)
        x = x + jnp.einsum("bsk,kh->bsh", m, lp["w2"],
                           preferred_element_type=jnp.float32) + lp["b2"].astype(jnp.float32)

    hf = ln(x, params["ln_f_g"], params["ln_f_b"]).astype(DTYPE)
    logits = jnp.einsum("bsh,hv->bsv", hf, params["lm_head"],
                        preferred_element_type=jnp.float32)
    return logits.astype(DTYPE)


if __name__ == "__main__":
    key = jax.random.PRNGKey(0)
    pkey, ikey = jax.random.split(key)

    params = init_params(pkey)

    B, S = 2, 8
    input_ids = jax.random.randint(ikey, (B, S), 0, VOCAB, dtype=jnp.int32)

    logits = model_logits_forward(params, input_ids)
    logits = jax.block_until_ready(logits)

    assert logits.shape == (B, S, VOCAB), logits.shape
    assert logits.dtype == DTYPE, logits.dtype
    assert bool(jnp.all(jnp.isfinite(logits.astype(jnp.float32))))

    ref = model_logits_reference(params, input_ids)
    max_err = float(jnp.max(jnp.abs(logits.astype(jnp.float32) - ref.astype(jnp.float32))))
    assert bool(jnp.allclose(logits.astype(jnp.float32), ref.astype(jnp.float32),
                             atol=5e-2, rtol=5e-2)), max_err

    print("KERNEL_OK")
</pallas_src>

<mosaic_0001>
module attributes {stable_mosaic.version = 11 : i64} {
  func.func @_fused_model_kernel(%arg0: i32, %arg1: memref<1x8x32xbf16, #tpu.memory_space<vmem>>, %arg2: memref<1x32xbf16, #tpu.memory_space<vmem>>, %arg3: memref<1x32xbf16, #tpu.memory_space<vmem>>, %arg4: memref<32x96xbf16, #tpu.memory_space<vmem>>, %arg5: memref<32x32xbf16, #tpu.memory_space<vmem>>, %arg6: memref<1x32xbf16, #tpu.memory_space<vmem>>, %arg7: memref<1x32xbf16, #tpu.memory_space<vmem>>, %arg8: memref<32x128xbf16, #tpu.memory_space<vmem>>, %arg9: memref<1x128xbf16, #tpu.memory_space<vmem>>, %arg10: memref<128x32xbf16, #tpu.memory_space<vmem>>, %arg11: memref<1x32xbf16, #tpu.memory_space<vmem>>, %arg12: memref<1x32xbf16, #tpu.memory_space<vmem>>, %arg13: memref<1x32xbf16, #tpu.memory_space<vmem>>, %arg14: memref<32x96xbf16, #tpu.memory_space<vmem>>, %arg15: memref<32x32xbf16, #tpu.memory_space<vmem>>, %arg16: memref<1x32xbf16, #tpu.memory_space<vmem>>, %arg17: memref<1x32xbf16, #tpu.memory_space<vmem>>, %arg18: memref<32x128xbf16, #tpu.memory_space<vmem>>, %arg19: memref<1x128xbf16, #tpu.memory_space<vmem>>, %arg20: memref<128x32xbf16, #tpu.memory_space<vmem>>, %arg21: memref<1x32xbf16, #tpu.memory_space<vmem>>, %arg22: memref<1x32xbf16, #tpu.memory_space<vmem>>, %arg23: memref<1x32xbf16, #tpu.memory_space<vmem>>, %arg24: memref<32x256xbf16, #tpu.memory_space<vmem>>, %arg25: memref<1x8x256xbf16, #tpu.memory_space<vmem>>) attributes {dimension_semantics = [#tpu.dimension_semantics<parallel>], iteration_bounds = array<i64: 2>, scalar_prefetch = 0 : i64, scratch_operands = 0 : i64, tpu.core_type = #tpu.core_type<tc>, window_params = [{transform_indices = @transform_0, window_bounds = array<i64: 1, 8, 32>}, {pipeline_mode = #tpu.pipeline_mode<synchronous>, transform_indices = @transform_1, window_bounds = array<i64: 1, 32>}, {pipeline_mode = #tpu.pipeline_mode<synchronous>, transform_indices = @transform_2, window_bounds = array<i64: 1, 32>}, {pipeline_mode = #tpu.pipeline_mode<synchronous>, transform_indices = @transform_3, window_bounds = array<i64: 32, 96>}, {pipeline_mode = #tpu.pipeline_mode<synchronous>, transform_indices = @transform_4, window_bounds = array<i64: 32, 32>}, {pipeline_mode = #tpu.pipeline_mode<synchronous>, transform_indices = @transform_5, window_bounds = array<i64: 1, 32>}, {pipeline_mode = #tpu.pipeline_mode<synchronous>, transform_indices = @transform_6, window_bounds = array<i64: 1, 32>}, {pipeline_mode = #tpu.pipeline_mode<synchronous>, transform_indices = @transform_7, window_bounds = array<i64: 32, 128>}, {pipeline_mode = #tpu.pipeline_mode<synchronous>, transform_indices = @transform_8, window_bounds = array<i64: 1, 128>}, {pipeline_mode = #tpu.pipeline_mode<synchronous>, transform_indices = @transform_9, window_bounds = array<i64: 128, 32>}, {pipeline_mode = #tpu.pipeline_mode<synchronous>, transform_indices = @transform_10, window_bounds = array<i64: 1, 32>}, {pipeline_mode = #tpu.pipeline_mode<synchronous>, transform_indices = @transform_11, window_bounds = array<i64: 1, 32>}, {pipeline_mode = #tpu.pipeline_mode<synchronous>, transform_indices = @transform_12, window_bounds = array<i64: 1, 32>}, {pipeline_mode = #tpu.pipeline_mode<synchronous>, transform_indices = @transform_13, window_bounds = array<i64: 32, 96>}, {pipeline_mode = #tpu.pipeline_mode<synchronous>, transform_indices = @transform_14, window_bounds = array<i64: 32, 32>}, {pipeline_mode = #tpu.pipeline_mode<synchronous>, transform_indices = @transform_15, window_bounds = array<i64: 1, 32>}, {pipeline_mode = #tpu.pipeline_mode<synchronous>, transform_indices = @transform_16, window_bounds = array<i64: 1, 32>}, {pipeline_mode = #tpu.pipeline_mode<synchronous>, transform_indices = @transform_17, window_bounds = array<i64: 32, 128>}, {pipeline_mode = #tpu.pipeline_mode<synchronous>, transform_indices = @transform_18, window_bounds = array<i64: 1, 128>}, {pipeline_mode = #tpu.pipeline_mode<synchronous>, transform_indices = @transform_19, window_bounds = array<i64: 128, 32>}, {pipeline_mode = #tpu.pipeline_mode<synchronous>, transform_indices = @transform_20, window_bounds = array<i64: 1, 32>}, {pipeline_mode = #tpu.pipeline_mode<synchronous>, transform_indices = @transform_21, window_bounds = array<i64: 1, 32>}, {pipeline_mode = #tpu.pipeline_mode<synchronous>, transform_indices = @transform_22, window_bounds = array<i64: 1, 32>}, {pipeline_mode = #tpu.pipeline_mode<synchronous>, transform_indices = @transform_23, window_bounds = array<i64: 32, 256>}, {transform_indices = @transform_24, window_bounds = array<i64: 1, 8, 256>}]} {
    %c0 = arith.constant 0 : index
    %c0_0 = arith.constant 0 : index
    %c0_1 = arith.constant 0 : index
    %0 = vector.load %arg1[%c0, %c0_0, %c0_1] : memref<1x8x32xbf16, #tpu.memory_space<vmem>>, vector<1x8x32xbf16>
    %1 = vector.shape_cast %0 : vector<1x8x32xbf16> to vector<8x32xbf16>
    %2 = arith.extf %1 : vector<8x32xbf16> to vector<8x32xf32>
    %3 = tpu.iota {dimensions = array<i32: 0>} : vector<8x8xi32>
    %4 = tpu.iota {dimensions = array<i32: 1>} : vector<8x8xi32>
    %5 = arith.cmpi sle, %4, %3 : vector<8x8xi32>
    %c0_2 = arith.constant 0 : index
    %c0_3 = arith.constant 0 : index
    %6 = vector.load %arg2[%c0_2, %c0_3] : memref<1x32xbf16, #tpu.memory_space<vmem>>, vector<1x32xbf16>
    %7 = arith.extf %6 : vector<1x32xbf16> to vector<1x32xf32>
    %c0_4 = arith.constant 0 : index
    %c0_5 = arith.constant 0 : index
    %8 = vector.load %arg3[%c0_4, %c0_5] : memref<1x32xbf16, #tpu.memory_space<vmem>>, vector<1x32xbf16>
    %9 = arith.extf %8 : vector<1x32xbf16> to vector<1x32xf32>
    %c0_6 = arith.constant 0 : index
    %c0_7 = arith.constant 0 : index
    %10 = vector.load %arg4[%c0_6, %c0_7] : memref<32x96xbf16, #tpu.memory_space<vmem>>, vector<32x96xbf16>
    %c0_8 = arith.constant 0 : index
    %c0_9 = arith.constant 0 : index
    %11 = vector.load %arg5[%c0_8, %c0_9] : memref<32x32xbf16, #tpu.memory_space<vmem>>, vector<32x32xbf16>
    %c0_10 = arith.constant 0 : index
    %c0_11 = arith.constant 0 : index
    %12 = vector.load %arg6[%c0_10, %c0_11] : memref<1x32xbf16, #tpu.memory_space<vmem>>, vector<1x32xbf16>
    %13 = arith.extf %12 : vector<1x32xbf16> to vector<1x32xf32>
    %c0_12 = arith.constant 0 : index
    %c0_13 = arith.constant 0 : index
    %14 = vector.load %arg7[%c0_12, %c0_13] : memref<1x32xbf16, #tpu.memory_space<vmem>>, vector<1x32xbf16>
    %15 = arith.extf %14 : vector<1x32xbf16> to vector<1x32xf32>
    %c0_14 = arith.constant 0 : index
    %c0_15 = arith.constant 0 : index
    %16 = vector.load %arg8[%c0_14, %c0_15] : memref<32x128xbf16, #tpu.memory_space<vmem>>, vector<32x128xbf16>
    %c0_16 = arith.constant 0 : index
    %c0_17 = arith.constant 0 : index
    %17 = vector.load %arg9[%c0_16, %c0_17] : memref<1x128xbf16, #tpu.memory_space<vmem>>, vector<1x128xbf16>
    %18 = arith.extf %17 : vector<1x128xbf16> to vector<1x128xf32>
    %c0_18 = arith.constant 0 : index
    %c0_19 = arith.constant 0 : index
    %19 = vector.load %arg10[%c0_18, %c0_19] : memref<128x32xbf16, #tpu.memory_space<vmem>>, vector<128x32xbf16>
    %c0_20 = arith.constant 0 : index
    %c0_21 = arith.constant 0 : index
    %20 = vector.load %arg11[%c0_20, %c0_21] : memref<1x32xbf16, #tpu.memory_space<vmem>>, vector<1x32xbf16>
    %21 = arith.extf %20 : vector<1x32xbf16> to vector<1x32xf32>
    %cst = arith.constant dense<0.000000e+00> : vector<8xf32>
    %22 = vector.multi_reduction <add>, %2, %cst [1] : vector<8x32xf32> to vector<8xf32>
    %23 = vector.shape_cast %22 : vector<8xf32> to vector<8x1xf32>
    %cst_22 = arith.constant 3.200000e+01 : f32
    %24 = vector.broadcast %cst_22 : f32 to vector<8x1xf32>
    %25 = arith.divf %23, %24 : vector<8x1xf32>
    %26 = vector.broadcast %25 : vector<8x1xf32> to vector<8x32xf32>
    %27 = arith.subf %2, %26 : vector<8x32xf32>
    %28 = arith.mulf %27, %27 : vector<8x32xf32>
    %cst_23 = arith.constant dense<0.000000e+00> : vector<8xf32>
    %29 = vector.multi_reduction <add>, %28, %cst_23 [1] : vector<8x32xf32> to vector<8xf32>
    %30 = vector.shape_cast %29 : vector<8xf32> to vector<8x1xf32>
    %cst_24 = arith.constant 3.200000e+01 : f32
    %31 = vector.broadcast %cst_24 : f32 to vector<8x1xf32>
    %32 = arith.divf %30, %31 : vector<8x1xf32>
    %cst_25 = arith.constant 9.99999974E-6 : f32
    %33 = vector.broadcast %cst_25 : f32 to vector<8x1xf32>
    %34 = arith.addf %32, %33 : vector<8x1xf32>
    %35 = math.rsqrt %34 : vector<8x1xf32>
    %36 = vector.broadcast %35 : vector<8x1xf32> to vector<8x32xf32>
    %37 = arith.mulf %27, %36 : vector<8x32xf32>
    %38 = vector.broadcast %7 : vector<1x32xf32> to vector<8x32xf32>
    %39 = arith.mulf %37, %38 : vector<8x32xf32>
    %40 = vector.broadcast %9 : vector<1x32xf32> to vector<8x32xf32>
    %41 = arith.addf %39, %40 : vector<8x32xf32>
    %42 = arith.truncf %41 : vector<8x32xf32> to vector<8x32xbf16>
    %cst_26 = arith.constant dense<0.000000e+00> : vector<8x96xf32>
    %43 = tpu.matmul %42, %10, %cst_26 {dimension_numbers = #tpu.dot_dimension_numbers<[1], [0], [0], [1], [0, 0, 1, 1], [], []>} : vector<8x32xbf16>, vector<32x96xbf16>, vector<8x96xf32> -> vector<8x96xf32>
    %cst_27 = arith.constant 0.000000e+00 : f32
    %44 = vector.broadcast %cst_27 : f32 to vector<8x32xf32>
    %45 = vector.extract_strided_slice %43 {offsets = [0, 0], sizes = [8, 16], strides = [1, 1]} : vector<8x96xf32> to vector<8x16xf32>
    %46 = arith.truncf %45 : vector<8x16xf32> to vector<8x16xbf16>
    %47 = vector.extract_strided_slice %43 {offsets = [0, 32], sizes = [8, 16], strides = [1, 1]} : vector<8x96xf32> to vector<8x16xf32>
    %48 = arith.truncf %47 : vector<8x16xf32> to vector<8x16xbf16>
    %49 = vector.extract_strided_slice %43 {offsets = [0, 64], sizes = [8, 16], strides = [1, 1]} : vector<8x96xf32> to vector<8x16xf32>
    %50 = arith.truncf %49 : vector<8x16xf32> to vector<8x16xbf16>
    %cst_28 = arith.constant dense<0.000000e+00> : vector<8x8xf32>
    %51 = tpu.matmul %46, %48, %cst_28 {dimension_numbers = #tpu.dot_dimension_numbers<[1], [1], [0], [0], [0, 0, 1, 0], [], []>} : vector<8x16xbf16>, vector<8x16xbf16>, vector<8x8xf32> -> vector<8x8xf32>
    %cst_29 = arith.constant 2.500000e-01 : f32
    %52 = vector.broadcast %cst_29 : f32 to vector<8x8xf32>
    %53 = arith.mulf %51, %52 : vector<8x8xf32>
    %cst_30 = arith.constant -1.000000e+30 : f32
    %54 = vector.broadcast %cst_30 : f32 to vector<8x8xf32>
    %55 = arith.select %5, %53, %54 : vector<8x8xi1>, vector<8x8xf32>
    %cst_31 = arith.constant dense<0xFF800000> : vector<8xf32>
    %56 = vector.multi_reduction <maximumf>, %55, %cst_31 [1] : vector<8x8xf32> to vector<8xf32>
    %57 = vector.shape_cast %56 : vector<8xf32> to vector<8x1xf32>
    %58 = vector.broadcast %57 : vector<8x1xf32> to vector<8x8xf32>
    %59 = arith.subf %55, %58 : vector<8x8xf32>
    %60 = math.exp %59 : vector<8x8xf32>
    %cst_32 = arith.constant dense<0.000000e+00> : vector<8xf32>
    %61 = vector.multi_reduction <add>, %60, %cst_32 [1] : vector<8x8xf32> to vector<8xf32>
    %62 = vector.shape_cast %61 : vector<8xf32> to vector<8x1xf32>
    %63 = tpu.reciprocal %62 {approx = true} : vector<8x1xf32> -> vector<8x1xf32>
    %64 = vector.broadcast %63 : vector<8x1xf32> to vector<8x8xf32>
    %65 = arith.mulf %60, %64 : vector<8x8xf32>
    %66 = arith.truncf %65 : vector<8x8xf32> to vector<8x8xbf16>
    %cst_33 = arith.constant dense<0.000000e+00> : vector<8x16xf32>
    %67 = tpu.matmul %66, %50, %cst_33 {dimension_numbers = #tpu.dot_dimension_numbers<[1], [0], [0], [1], [0, 0, 1, 1], [], []>} : vector<8x8xbf16>, vector<8x16xbf16>, vector<8x16xf32> -> vector<8x16xf32>
    %68 = arith.truncf %67 : vector<8x16xf32> to vector<8x16xbf16>
    %69 = vector.extract_strided_slice %11 {offsets = [0, 0], sizes = [16, 32], strides = [1, 1]} : vector<32x32xbf16> to vector<16x32xbf16>
    %cst_34 = arith.constant dense<0.000000e+00> : vector<8x32xf32>
    %70 = tpu.matmul %68, %69, %cst_34 {dimension_numbers = #tpu.dot_dimension_numbers<[1], [0], [0], [1], [0, 0, 1, 1], [], []>} : vector<8x16xbf16>, vector<16x32xbf16>, vector<8x32xf32> -> vector<8x32xf32>
    %71 = arith.addf %44, %70 : vector<8x32xf32>
    %72 = vector.extract_strided_slice %43 {offsets = [0, 16], sizes = [8, 16], strides = [1, 1]} : vector<8x96xf32> to vector<8x16xf32>
    %73 = arith.truncf %72 : vector<8x16xf32> to vector<8x16xbf16>
    %74 = vector.extract_strided_slice %43 {offsets = [0, 48], sizes = [8, 16], strides = [1, 1]} : vector<8x96xf32> to vector<8x16xf32>
    %75 = arith.truncf %74 : vector<8x16xf32> to vector<8x16xbf16>
    %76 = vector.extract_strided_slice %43 {offsets = [0, 80], sizes = [8, 16], strides = [1, 1]} : vector<8x96xf32> to vector<8x16xf32>
    %77 = arith.truncf %76 : vector<8x16xf32> to vector<8x16xbf16>
    %cst_35 = arith.constant dense<0.000000e+00> : vector<8x8xf32>
    %78 = tpu.matmul %73, %75, %cst_35 {dimension_numbers = #tpu.dot_dimension_numbers<[1], [1], [0], [0], [0, 0, 1, 0], [], []>} : vector<8x16xbf16>, vector<8x16xbf16>, vector<8x8xf32> -> vector<8x8xf32>
    %cst_36 = arith.constant 2.500000e-01 : f32
    %79 = vector.broadcast %cst_36 : f32 to vector<8x8xf32>
    %80 = arith.mulf %78, %79 : vector<8x8xf32>
    %cst_37 = arith.constant -1.000000e+30 : f32
    %81 = vector.broadcast %cst_37 : f32 to vector<8x8xf32>
    %82 = arith.select %5, %80, %81 : vector<8x8xi1>, vector<8x8xf32>
    %cst_38 = arith.constant dense<0xFF800000> : vector<8xf32>
    %83 = vector.multi_reduction <maximumf>, %82, %cst_38 [1] : vector<8x8xf32> to vector<8xf32>
    %84 = vector.shape_cast %83 : vector<8xf32> to vector<8x1xf32>
    %85 = vector.broadcast %84 : vector<8x1xf32> to vector<8x8xf32>
    %86 = arith.subf %82, %85 : vector<8x8xf32>
    %87 = math.exp %86 : vector<8x8xf32>
    %cst_39 = arith.constant dense<0.000000e+00> : vector<8xf32>
    %88 = vector.multi_reduction <add>, %87, %cst_39 [1] : vector<8x8xf32> to vector<8xf32>
    %89 = vector.shape_cast %88 : vector<8xf32> to vector<8x1xf32>
    %90 = tpu.reciprocal %89 {approx = true} : vector<8x1xf32> -> vector<8x1xf32>
    %91 = vector.broadcast %90 : vector<8x1xf32> to vector<8x8xf32>
    %92 = arith.mulf %87, %91 : vector<8x8xf32>
    %93 = arith.truncf %92 : vector<8x8xf32> to vector<8x8xbf16>
    %cst_40 = arith.constant dense<0.000000e+00> : vector<8x16xf32>
    %94 = tpu.matmul %93, %77, %cst_40 {dimension_numbers = #tpu.dot_dimension_numbers<[1], [0], [0], [1], [0, 0, 1, 1], [], []>} : vector<8x8xbf16>, vector<8x16xbf16>, vector<8x16xf32> -> vector<8x16xf32>
    %95 = arith.truncf %94 : vector<8x16xf32> to vector<8x16xbf16>
    %96 = vector.extract_strided_slice %11 {offsets = [16, 0], sizes = [16, 32], strides = [1, 1]} : vector<32x32xbf16> to vector<16x32xbf16>
    %cst_41 = arith.constant dense<0.000000e+00> : vector<8x32xf32>
    %97 = tpu.matmul %95, %96, %cst_41 {dimension_numbers = #tpu.dot_dimension_numbers<[1], [0], [0], [1], [0, 0, 1, 1], [], []>} : vector<8x16xbf16>, vector<16x32xbf16>, vector<8x32xf32> -> vector<8x32xf32>
    %98 = arith.addf %71, %97 : vector<8x32xf32>
    %99 = arith.addf %2, %98 : vector<8x32xf32>
    %cst_42 = arith.constant dense<0.000000e+00> : vector<8xf32>
    %100 = vector.multi_reduction <add>, %99, %cst_42 [1] : vector<8x32xf32> to vector<8xf32>
    %101 = vector.shape_cast %100 : vector<8xf32> to vector<8x1xf32>
    %cst_43 = arith.constant 3.200000e+01 : f32
    %102 = vector.broadcast %cst_43 : f32 to vector<8x1xf32>
    %103 = arith.divf %101, %102 : vector<8x1xf32>
    %104 = vector.broadcast %103 : vector<8x1xf32> to vector<8x32xf32>
    %105 = arith.subf %99, %104 : vector<8x32xf32>
    %106 = arith.mulf %105, %105 : vector<8x32xf32>
    %cst_44 = arith.constant dense<0.000000e+00> : vector<8xf32>
    %107 = vector.multi_reduction <add>, %106, %cst_44 [1] : vector<8x32xf32> to vector<8xf32>
    %108 = vector.shape_cast %107 : vector<8xf32> to vector<8x1xf32>
    %cst_45 = arith.constant 3.200000e+01 : f32
    %109 = vector.broadcast %cst_45 : f32 to vector<8x1xf32>
    %110 = arith.divf %108, %109 : vector<8x1xf32>
    %cst_46 = arith.constant 9.99999974E-6 : f32
    %111 = vector.broadcast %cst_46 : f32 to vector<8x1xf32>
    %112 = arith.addf %110, %111 : vector<8x1xf32>
    %113 = math.rsqrt %112 : vector<8x1xf32>
    %114 = vector.broadcast %113 : vector<8x1xf32> to vector<8x32xf32>
    %115 = arith.mulf %105, %114 : vector<8x32xf32>
    %116 = vector.broadcast %13 : vector<1x32xf32> to vector<8x32xf32>
    %117 = arith.mulf %115, %116 : vector<8x32xf32>
    %118 = vector.broadcast %15 : vector<1x32xf32> to vector<8x32xf32>
    %119 = arith.addf %117, %118 : vector<8x32xf32>
    %120 = arith.truncf %119 : vector<8x32xf32> to vector<8x32xbf16>
    %cst_47 = arith.constant dense<0.000000e+00> : vector<8x128xf32>
    %121 = tpu.matmul %120, %16, %cst_47 {dimension_numbers = #tpu.dot_dimension_numbers<[1], [0], [0], [1], [0, 0, 1, 1], [], []>} : vector<8x32xbf16>, vector<32x128xbf16>, vector<8x128xf32> -> vector<8x128xf32>
    %122 = vector.broadcast %18 : vector<1x128xf32> to vector<8x128xf32>
    %123 = arith.addf %121, %122 : vector<8x128xf32>
    %cst_48 = arith.constant 5.000000e-01 : f32
    %124 = vector.broadcast %cst_48 : f32 to vector<8x128xf32>
    %125 = arith.mulf %124, %123 : vector<8x128xf32>
    %cst_49 = arith.constant 4.471500e-02 : f32
    %126 = vector.broadcast %cst_49 : f32 to vector<8x128xf32>
    %127 = arith.mulf %126, %123 : vector<8x128xf32>
    %128 = arith.mulf %127, %123 : vector<8x128xf32>
    %129 = arith.mulf %128, %123 : vector<8x128xf32>
    %130 = arith.addf %123, %129 : vector<8x128xf32>
    %cst_50 = arith.constant 0.797884583 : f32
    %131 = vector.broadcast %cst_50 : f32 to vector<8x128xf32>
    %132 = arith.mulf %131, %130 : vector<8x128xf32>
    %133 = math.tanh %132 : vector<8x128xf32>
    %cst_51 = arith.constant 1.000000e+00 : f32
    %134 = vector.broadcast %cst_51 : f32 to vector<8x128xf32>
    %135 = arith.addf %134, %133 : vector<8x128xf32>
    %136 = arith.mulf %125, %135 : vector<8x128xf32>
    %137 = arith.truncf %136 : vector<8x128xf32> to vector<8x128xbf16>
    %cst_52 = arith.constant dense<0.000000e+00> : vector<8x32xf32>
    %138 = tpu.matmul %137, %19, %cst_52 {dimension_numbers = #tpu.dot_dimension_numbers<[1], [0], [0], [1], [0, 0, 1, 1], [], []>} : vector<8x128xbf16>, vector<128x32xbf16>, vector<8x32xf32> -> vector<8x32xf32>
    %139 = arith.addf %99, %138 : vector<8x32xf32>
    %140 = vector.broadcast %21 : vector<1x32xf32> to vector<8x32xf32>
    %141 = arith.addf %139, %140 : vector<8x32xf32>
    %c0_53 = arith.constant 0 : index
    %c0_54 = arith.constant 0 : index
    %142 = vector.load %arg12[%c0_53, %c0_54] : memref<1x32xbf16, #tpu.memory_space<vmem>>, vector<1x32xbf16>
    %143 = arith.extf %142 : vector<1x32xbf16> to vector<1x32xf32>
    %c0_55 = arith.constant 0 : index
    %c0_56 = arith.constant 0 : index
    %144 = vector.load %arg13[%c0_55, %c0_56] : memref<1x32xbf16, #tpu.memory_space<vmem>>, vector<1x32xbf16>
    %145 = arith.extf %144 : vector<1x32xbf16> to vector<1x32xf32>
    %c0_57 = arith.constant 0 : index
    %c0_58 = arith.constant 0 : index
    %146 = vector.load %arg14[%c0_57, %c0_58] : memref<32x96xbf16, #tpu.memory_space<vmem>>, vector<32x96xbf16>
    %c0_59 = arith.constant 0 : index
    %c0_60 = arith.constant 0 : index
    %147 = vector.load %arg15[%c0_59, %c0_60] : memref<32x32xbf16, #tpu.memory_space<vmem>>, vector<32x32xbf16>
    %c0_61 = arith.constant 0 : index
    %c0_62 = arith.constant 0 : index
    %148 = vector.load %arg16[%c0_61, %c0_62] : memref<1x32xbf16, #tpu.memory_space<vmem>>, vector<1x32xbf16>
    %149 = arith.extf %148 : vector<1x32xbf16> to vector<1x32xf32>
    %c0_63 = arith.constant 0 : index
    %c0_64 = arith.constant 0 : index
    %150 = vector.load %arg17[%c0_63, %c0_64] : memref<1x32xbf16, #tpu.memory_space<vmem>>, vector<1x32xbf16>
    %151 = arith.extf %150 : vector<1x32xbf16> to vector<1x32xf32>
    %c0_65 = arith.constant 0 : index
    %c0_66 = arith.constant 0 : index
    %152 = vector.load %arg18[%c0_65, %c0_66] : memref<32x128xbf16, #tpu.memory_space<vmem>>, vector<32x128xbf16>
    %c0_67 = arith.constant 0 : index
    %c0_68 = arith.constant 0 : index
    %153 = vector.load %arg19[%c0_67, %c0_68] : memref<1x128xbf16, #tpu.memory_space<vmem>>, vector<1x128xbf16>
    %154 = arith.extf %153 : vector<1x128xbf16> to vector<1x128xf32>
    %c0_69 = arith.constant 0 : index
    %c0_70 = arith.constant 0 : index
    %155 = vector.load %arg20[%c0_69, %c0_70] : memref<128x32xbf16, #tpu.memory_space<vmem>>, vector<128x32xbf16>
    %c0_71 = arith.constant 0 : index
    %c0_72 = arith.constant 0 : index
    %156 = vector.load %arg21[%c0_71, %c0_72] : memref<1x32xbf16, #tpu.memory_space<vmem>>, vector<1x32xbf16>
    %157 = arith.extf %156 : vector<1x32xbf16> to vector<1x32xf32>
    %cst_73 = arith.constant dense<0.000000e+00> : vector<8xf32>
    %158 = vector.multi_reduction <add>, %141, %cst_73 [1] : vector<8x32xf32> to vector<8xf32>
    %159 = vector.shape_cast %158 : vector<8xf32> to vector<8x1xf32>
    %cst_74 = arith.constant 3.200000e+01 : f32
    %160 = vector.broadcast %cst_74 : f32 to vector<8x1xf32>
    %161 = arith.divf %159, %160 : vector<8x1xf32>
    %162 = vector.broadcast %161 : vector<8x1xf32> to vector<8x32xf32>
    %163 = arith.subf %141, %162 : vector<8x32xf32>
    %164 = arith.mulf %163, %163 : vector<8x32xf32>
    %cst_75 = arith.constant dense<0.000000e+00> : vector<8xf32>
    %165 = vector.multi_reduction <add>, %164, %cst_75 [1] : vector<8x32xf32> to vector<8xf32>
    %166 = vector.shape_cast %165 : vector<8xf32> to vector<8x1xf32>
    %cst_76 = arith.constant 3.200000e+01 : f32
    %167 = vector.broadcast %cst_76 : f32 to vector<8x1xf32>
    %168 = arith.divf %166, %167 : vector<8x1xf32>
    %cst_77 = arith.constant 9.99999974E-6 : f32
    %169 = vector.broadcast %cst_77 : f32 to vector<8x1xf32>
    %170 = arith.addf %168, %169 : vector<8x1xf32>
    %171 = math.rsqrt %170 : vector<8x1xf32>
    %172 = vector.broadcast %171 : vector<8x1xf32> to vector<8x32xf32>
    %173 = arith.mulf %163, %172 : vector<8x32xf32>
    %174 = vector.broadcast %143 : vector<1x32xf32> to vector<8x32xf32>
    %175 = arith.mulf %173, %174 : vector<8x32xf32>
    %176 = vector.broadcast %145 : vector<1x32xf32> to vector<8x32xf32>
    %177 = arith.addf %175, %176 : vector<8x32xf32>
    %178 = arith.truncf %177 : vector<8x32xf32> to vector<8x32xbf16>
    %cst_78 = arith.constant dense<0.000000e+00> : vector<8x96xf32>
    %179 = tpu.matmul %178, %146, %cst_78 {dimension_numbers = #tpu.dot_dimension_numbers<[1], [0], [0], [1], [0, 0, 1, 1], [], []>} : vector<8x32xbf16>, vector<32x96xbf16>, vector<8x96xf32> -> vector<8x96xf32>
    %cst_79 = arith.constant 0.000000e+00 : f32
    %180 = vector.broadcast %cst_79 : f32 to vector<8x32xf32>
    %181 = vector.extract_strided_slice %179 {offsets = [0, 0], sizes = [8, 16], strides = [1, 1]} : vector<8x96xf32> to vector<8x16xf32>
    %182 = arith.truncf %181 : vector<8x16xf32> to vector<8x16xbf16>
    %183 = vector.extract_strided_slice %179 {offsets = [0, 32], sizes = [8, 16], strides = [1, 1]} : vector<8x96xf32> to vector<8x16xf32>
    %184 = arith.truncf %183 : vector<8x16xf32> to vector<8x16xbf16>
    %185 = vector.extract_strided_slice %179 {offsets = [0, 64], sizes = [8, 16], strides = [1, 1]} : vector<8x96xf32> to vector<8x16xf32>
    %186 = arith.truncf %185 : vector<8x16xf32> to vector<8x16xbf16>
    %cst_80 = arith.constant dense<0.000000e+00> : vector<8x8xf32>
    %187 = tpu.matmul %182, %184, %cst_80 {dimension_numbers = #tpu.dot_dimension_numbers<[1], [1], [0], [0], [0, 0, 1, 0], [], []>} : vector<8x16xbf16>, vector<8x16xbf16>, vector<8x8xf32> -> vector<8x8xf32>
    %cst_81 = arith.constant 2.500000e-01 : f32
    %188 = vector.broadcast %cst_81 : f32 to vector<8x8xf32>
    %189 = arith.mulf %187, %188 : vector<8x8xf32>
    %cst_82 = arith.constant -1.000000e+30 : f32
    %190 = vector.broadcast %cst_82 : f32 to vector<8x8xf32>
    %191 = arith.select %5, %189, %190 : vector<8x8xi1>, vector<8x8xf32>
    %cst_83 = arith.constant dense<0xFF800000> : vector<8xf32>
    %192 = vector.multi_reduction <maximumf>, %191, %cst_83 [1] : vector<8x8xf32> to vector<8xf32>
    %193 = vector.shape_cast %192 : vector<8xf32> to vector<8x1xf32>
    %194 = vector.broadcast %193 : vector<8x1xf32> to vector<8x8xf32>
    %195 = arith.subf %191, %194 : vector<8x8xf32>
    %196 = math.exp %195 : vector<8x8xf32>
    %cst_84 = arith.constant dense<0.000000e+00> : vector<8xf32>
    %197 = vector.multi_reduction <add>, %196, %cst_84 [1] : vector<8x8xf32> to vector<8xf32>
    %198 = vector.shape_cast %197 : vector<8xf32> to vector<8x1xf32>
    %199 = tpu.reciprocal %198 {approx = true} : vector<8x1xf32> -> vector<8x1xf32>
    %200 = vector.broadcast %199 : vector<8x1xf32> to vector<8x8xf32>
    %201 = arith.mulf %196, %200 : vector<8x8xf32>
    %202 = arith.truncf %201 : vector<8x8xf32> to vector<8x8xbf16>
    %cst_85 = arith.constant dense<0.000000e+00> : vector<8x16xf32>
    %203 = tpu.matmul %202, %186, %cst_85 {dimension_numbers = #tpu.dot_dimension_numbers<[1], [0], [0], [1], [0, 0, 1, 1], [], []>} : vector<8x8xbf16>, vector<8x16xbf16>, vector<8x16xf32> -> vector<8x16xf32>
    %204 = arith.truncf %203 : vector<8x16xf32> to vector<8x16xbf16>
    %205 = vector.extract_strided_slice %147 {offsets = [0, 0], sizes = [16, 32], strides = [1, 1]} : vector<32x32xbf16> to vector<16x32xbf16>
    %cst_86 = arith.constant dense<0.000000e+00> : vector<8x32xf32>
    %206 = tpu.matmul %204, %205, %cst_86 {dimension_numbers = #tpu.dot_dimension_numbers<[1], [0], [0], [1], [0, 0, 1, 1], [], []>} : vector<8x16xbf16>, vector<16x32xbf16>, vector<8x32xf32> -> vector<8x32xf32>
    %207 = arith.addf %180, %206 : vector<8x32xf32>
    %208 = vector.extract_strided_slice %179 {offsets = [0, 16], sizes = [8, 16], strides = [1, 1]} : vector<8x96xf32> to vector<8x16xf32>
    %209 = arith.truncf %208 : vector<8x16xf32> to vector<8x16xbf16>
    %210 = vector.extract_strided_slice %179 {offsets = [0, 48], sizes = [8, 16], strides = [1, 1]} : vector<8x96xf32> to vector<8x16xf32>
    %211 = arith.truncf %210 : vector<8x16xf32> to vector<8x16xbf16>
    %212 = vector.extract_strided_slice %179 {offsets = [0, 80], sizes = [8, 16], strides = [1, 1]} : vector<8x96xf32> to vector<8x16xf32>
    %213 = arith.truncf %212 : vector<8x16xf32> to vector<8x16xbf16>
    %cst_87 = arith.constant dense<0.000000e+00> : vector<8x8xf32>
    %214 = tpu.matmul %209, %211, %cst_87 {dimension_numbers = #tpu.dot_dimension_numbers<[1], [1], [0], [0], [0, 0, 1, 0], [], []>} : vector<8x16xbf16>, vector<8x16xbf16>, vector<8x8xf32> -> vector<8x8xf32>
    %cst_88 = arith.constant 2.500000e-01 : f32
    %215 = vector.broadcast %cst_88 : f32 to vector<8x8xf32>
    %216 = arith.mulf %214, %215 : vector<8x8xf32>
    %cst_89 = arith.constant -1.000000e+30 : f32
    %217 = vector.broadcast %cst_89 : f32 to vector<8x8xf32>
    %218 = arith.select %5, %216, %217 : vector<8x8xi1>, vector<8x8xf32>
    %cst_90 = arith.constant dense<0xFF800000> : vector<8xf32>
    %219 = vector.multi_reduction <maximumf>, %218, %cst_90 [1] : vector<8x8xf32> to vector<8xf32>
    %220 = vector.shape_cast %219 : vector<8xf32> to vector<8x1xf32>
    %221 = vector.broadcast %220 : vector<8x1xf32> to vector<8x8xf32>
    %222 = arith.subf %218, %221 : vector<8x8xf32>
    %223 = math.exp %222 : vector<8x8xf32>
    %cst_91 = arith.constant dense<0.000000e+00> : vector<8xf32>
    %224 = vector.multi_reduction <add>, %223, %cst_91 [1] : vector<8x8xf32> to vector<8xf32>
    %225 = vector.shape_cast %224 : vector<8xf32> to vector<8x1xf32>
    %226 = tpu.reciprocal %225 {approx = true} : vector<8x1xf32> -> vector<8x1xf32>
    %227 = vector.broadcast %226 : vector<8x1xf32> to vector<8x8xf32>
    %228 = arith.mulf %223, %227 : vector<8x8xf32>
    %229 = arith.truncf %228 : vector<8x8xf32> to vector<8x8xbf16>
    %cst_92 = arith.constant dense<0.000000e+00> : vector<8x16xf32>
    %230 = tpu.matmul %229, %213, %cst_92 {dimension_numbers = #tpu.dot_dimension_numbers<[1], [0], [0], [1], [0, 0, 1, 1], [], []>} : vector<8x8xbf16>, vector<8x16xbf16>, vector<8x16xf32> -> vector<8x16xf32>
    %231 = arith.truncf %230 : vector<8x16xf32> to vector<8x16xbf16>
    %232 = vector.extract_strided_slice %147 {offsets = [16, 0], sizes = [16, 32], strides = [1, 1]} : vector<32x32xbf16> to vector<16x32xbf16>
    %cst_93 = arith.constant dense<0.000000e+00> : vector<8x32xf32>
    %233 = tpu.matmul %231, %232, %cst_93 {dimension_numbers = #tpu.dot_dimension_numbers<[1], [0], [0], [1], [0, 0, 1, 1], [], []>} : vector<8x16xbf16>, vector<16x32xbf16>, vector<8x32xf32> -> vector<8x32xf32>
    %234 = arith.addf %207, %233 : vector<8x32xf32>
    %235 = arith.addf %141, %234 : vector<8x32xf32>
    %cst_94 = arith.constant dense<0.000000e+00> : vector<8xf32>
    %236 = vector.multi_reduction <add>, %235, %cst_94 [1] : vector<8x32xf32> to vector<8xf32>
    %237 = vector.shape_cast %236 : vector<8xf32> to vector<8x1xf32>
    %cst_95 = arith.constant 3.200000e+01 : f32
    %238 = vector.broadcast %cst_95 : f32 to vector<8x1xf32>
    %239 = arith.divf %237, %238 : vector<8x1xf32>
    %240 = vector.broadcast %239 : vector<8x1xf32> to vector<8x32xf32>
    %241 = arith.subf %235, %240 : vector<8x32xf32>
    %242 = arith.mulf %241, %241 : vector<8x32xf32>
    %cst_96 = arith.constant dense<0.000000e+00> : vector<8xf32>
    %243 = vector.multi_reduction <add>, %242, %cst_96 [1] : vector<8x32xf32> to vector<8xf32>
    %244 = vector.shape_cast %243 : vector<8xf32> to vector<8x1xf32>
    %cst_97 = arith.constant 3.200000e+01 : f32
    %245 = vector.broadcast %cst_97 : f32 to vector<8x1xf32>
    %246 = arith.divf %244, %245 : vector<8x1xf32>
    %cst_98 = arith.constant 9.99999974E-6 : f32
    %247 = vector.broadcast %cst_98 : f32 to vector<8x1xf32>
    %248 = arith.addf %246, %247 : vector<8x1xf32>
    %249 = math.rsqrt %248 : vector<8x1xf32>
    %250 = vector.broadcast %249 : vector<8x1xf32> to vector<8x32xf32>
    %251 = arith.mulf %241, %250 : vector<8x32xf32>
    %252 = vector.broadcast %149 : vector<1x32xf32> to vector<8x32xf32>
    %253 = arith.mulf %251, %252 : vector<8x32xf32>
    %254 = vector.broadcast %151 : vector<1x32xf32> to vector<8x32xf32>
    %255 = arith.addf %253, %254 : vector<8x32xf32>
    %256 = arith.truncf %255 : vector<8x32xf32> to vector<8x32xbf16>
    %cst_99 = arith.constant dense<0.000000e+00> : vector<8x128xf32>
    %257 = tpu.matmul %256, %152, %cst_99 {dimension_numbers = #tpu.dot_dimension_numbers<[1], [0], [0], [1], [0, 0, 1, 1], [], []>} : vector<8x32xbf16>, vector<32x128xbf16>, vector<8x128xf32> -> vector<8x128xf32>
    %258 = vector.broadcast %154 : vector<1x128xf32> to vector<8x128xf32>
    %259 = arith.addf %257, %258 : vector<8x128xf32>
    %cst_100 = arith.constant 5.000000e-01 : f32
    %260 = vector.broadcast %cst_100 : f32 to vector<8x128xf32>
    %261 = arith.mulf %260, %259 : vector<8x128xf32>
    %cst_101 = arith.constant 4.471500e-02 : f32
    %262 = vector.broadcast %cst_101 : f32 to vector<8x128xf32>
    %263 = arith.mulf %262, %259 : vector<8x128xf32>
    %264 = arith.mulf %263, %259 : vector<8x128xf32>
    %265 = arith.mulf %264, %259 : vector<8x128xf32>
    %266 = arith.addf %259, %265 : vector<8x128xf32>
    %cst_102 = arith.constant 0.797884583 : f32
    %267 = vector.broadcast %cst_102 : f32 to vector<8x128xf32>
    %268 = arith.mulf %267, %266 : vector<8x128xf32>
    %269 = math.tanh %268 : vector<8x128xf32>
    %cst_103 = arith.constant 1.000000e+00 : f32
    %270 = vector.broadcast %cst_103 : f32 to vector<8x128xf32>
    %271 = arith.addf %270, %269 : vector<8x128xf32>
    %272 = arith.mulf %261, %271 : vector<8x128xf32>
    %273 = arith.truncf %272 : vector<8x128xf32> to vector<8x128xbf16>
    %cst_104 = arith.constant dense<0.000000e+00> : vector<8x32xf32>
    %274 = tpu.matmul %273, %155, %cst_104 {dimension_numbers = #tpu.dot_dimension_numbers<[1], [0], [0], [1], [0, 0, 1, 1], [], []>} : vector<8x128xbf16>, vector<128x32xbf16>, vector<8x32xf32> -> vector<8x32xf32>
    %275 = arith.addf %235, %274 : vector<8x32xf32>
    %276 = vector.broadcast %157 : vector<1x32xf32> to vector<8x32xf32>
    %277 = arith.addf %275, %276 : vector<8x32xf32>
    %c0_105 = arith.constant 0 : index
    %c0_106 = arith.constant 0 : index
    %278 = vector.load %arg22[%c0_105, %c0_106] : memref<1x32xbf16, #tpu.memory_space<vmem>>, vector<1x32xbf16>
    %279 = arith.extf %278 : vector<1x32xbf16> to vector<1x32xf32>
    %c0_107 = arith.constant 0 : index
    %c0_108 = arith.constant 0 : index
    %280 = vector.load %arg23[%c0_107, %c0_108] : memref<1x32xbf16, #tpu.memory_space<vmem>>, vector<1x32xbf16>
    %281 = arith.extf %280 : vector<1x32xbf16> to vector<1x32xf32>
    %c0_109 = arith.constant 0 : index
    %c0_110 = arith.constant 0 : index
    %282 = vector.load %arg24[%c0_109, %c0_110] : memref<32x256xbf16, #tpu.memory_space<vmem>>, vector<32x256xbf16>
    %cst_111 = arith.constant dense<0.000000e+00> : vector<8xf32>
    %283 = vector.multi_reduction <add>, %277, %cst_111 [1] : vector<8x32xf32> to vector<8xf32>
    %284 = vector.shape_cast %283 : vector<8xf32> to vector<8x1xf32>
    %cst_112 = arith.constant 3.200000e+01 : f32
    %285 = vector.broadcast %cst_112 : f32 to vector<8x1xf32>
    %286 = arith.divf %284, %285 : vector<8x1xf32>
    %287 = vector.broadcast %286 : vector<8x1xf32> to vector<8x32xf32>
    %288 = arith.subf %277, %287 : vector<8x32xf32>
    %289 = arith.mulf %288, %288 : vector<8x32xf32>
    %cst_113 = arith.constant dense<0.000000e+00> : vector<8xf32>
    %290 = vector.multi_reduction <add>, %289, %cst_113 [1] : vector<8x32xf32> to vector<8xf32>
    %291 = vector.shape_cast %290 : vector<8xf32> to vector<8x1xf32>
    %cst_114 = arith.constant 3.200000e+01 : f32
    %292 = vector.broadcast %cst_114 : f32 to vector<8x1xf32>
    %293 = arith.divf %291, %292 : vector<8x1xf32>
    %cst_115 = arith.constant 9.99999974E-6 : f32
    %294 = vector.broadcast %cst_115 : f32 to vector<8x1xf32>
    %295 = arith.addf %293, %294 : vector<8x1xf32>
    %296 = math.rsqrt %295 : vector<8x1xf32>
    %297 = vector.broadcast %296 : vector<8x1xf32> to vector<8x32xf32>
    %298 = arith.mulf %288, %297 : vector<8x32xf32>
    %299 = vector.broadcast %279 : vector<1x32xf32> to vector<8x32xf32>
    %300 = arith.mulf %298, %299 : vector<8x32xf32>
    %301 = vector.broadcast %281 : vector<1x32xf32> to vector<8x32xf32>
    %302 = arith.addf %300, %301 : vector<8x32xf32>
    %303 = arith.truncf %302 : vector<8x32xf32> to vector<8x32xbf16>
    %cst_116 = arith.constant dense<0.000000e+00> : vector<8x256xf32>
    %304 = tpu.matmul %303, %282, %cst_116 {dimension_numbers = #tpu.dot_dimension_numbers<[1], [0], [0], [1], [0, 0, 1, 1], [], []>} : vector<8x32xbf16>, vector<32x256xbf16>, vector<8x256xf32> -> vector<8x256xf32>
    %305 = arith.truncf %304 : vector<8x256xf32> to vector<8x256xbf16>
    %c0_117 = arith.constant 0 : index
    %c0_118 = arith.constant 0 : index
    %c0_119 = arith.constant 0 : index
    %306 = vector.load %arg25[%c0_117, %c0_118, %c0_119] : memref<1x8x256xbf16, #tpu.memory_space<vmem>>, vector<1x8x256xbf16>
    %307 = vector.shape_cast %306 : vector<1x8x256xbf16> to vector<8x256xbf16>
    %308 = vector.shape_cast %305 : vector<8x256xbf16> to vector<1x8x256xbf16>
    tpu.vector_store %arg25[%c0_117, %c0_118, %c0_119], %308 {strides = array<i32>} : memref<1x8x256xbf16, #tpu.memory_space<vmem>>, vector<1x8x256xbf16>,
    return
  }
  func.func @transform_0(%arg0: i32) -> (i32, i32, i32) {
    %c0_i32 = arith.constant 0 : i32
    %c0_i32_0 = arith.constant 0 : i32
    %c0_i32_1 = arith.constant 0 : i32
    return %arg0, %c0_i32, %c0_i32_0 : i32, i32, i32
  }
  func.func @transform_1(%arg0: i32) -> (i32, i32) {
    %c0_i32 = arith.constant 0 : i32
    %c0_i32_0 = arith.constant 0 : i32
    %c0_i32_1 = arith.constant 0 : i32
    return %c0_i32, %c0_i32_0 : i32, i32
  }
  func.func @transform_2(%arg0: i32) -> (i32, i32) {
    %c0_i32 = arith.constant 0 : i32
    %c0_i32_0 = arith.constant 0 : i32
    %c0_i32_1 = arith.constant 0 : i32
    return %c0_i32, %c0_i32_0 : i32, i32
  }
  func.func @transform_3(%arg0: i32) -> (i32, i32) {
    %c0_i32 = arith.constant 0 : i32
    %c0_i32_0 = arith.constant 0 : i32
    %c0_i32_1 = arith.constant 0 : i32
    return %c0_i32, %c0_i32_0 : i32, i32
  }
  func.func @transform_4(%arg0: i32) -> (i32, i32) {
    %c0_i32 = arith.constant 0 : i32
    %c0_i32_0 = arith.constant 0 : i32
    %c0_i32_1 = arith.constant 0 : i32
    return %c0_i32, %c0_i32_0 : i32, i32
  }
  func.func @transform_5(%arg0: i32) -> (i32, i32) {
    %c0_i32 = arith.constant 0 : i32
    %c0_i32_0 = arith.constant 0 : i32
    %c0_i32_1 = arith.constant 0 : i32
    return %c0_i32, %c0_i32_0 : i32, i32
  }
  func.func @transform_6(%arg0: i32) -> (i32, i32) {
    %c0_i32 = arith.constant 0 : i32
    %c0_i32_0 = arith.constant 0 : i32
    %c0_i32_1 = arith.constant 0 : i32
    return %c0_i32, %c0_i32_0 : i32, i32
  }
  func.func @transform_7(%arg0: i32) -> (i32, i32) {
    %c0_i32 = arith.constant 0 : i32
    %c0_i32_0 = arith.constant 0 : i32
    %c0_i32_1 = arith.constant 0 : i32
    return %c0_i32, %c0_i32_0 : i32, i32
  }
  func.func @transform_8(%arg0: i32) -> (i32, i32) {
    %c0_i32 = arith.constant 0 : i32
    %c0_i32_0 = arith.constant 0 : i32
    %c0_i32_1 = arith.constant 0 : i32
    return %c0_i32, %c0_i32_0 : i32, i32
  }
  func.func @transform_9(%arg0: i32) -> (i32, i32) {
    %c0_i32 = arith.constant 0 : i32
    %c0_i32_0 = arith.constant 0 : i32
    %c0_i32_1 = arith.constant 0 : i32
    return %c0_i32, %c0_i32_0 : i32, i32
  }
  func.func @transform_10(%arg0: i32) -> (i32, i32) {
    %c0_i32 = arith.constant 0 : i32
    %c0_i32_0 = arith.constant 0 : i32
    %c0_i32_1 = arith.constant 0 : i32
    return %c0_i32, %c0_i32_0 : i32, i32
  }
  func.func @transform_11(%arg0: i32) -> (i32, i32) {
    %c0_i32 = arith.constant 0 : i32
    %c0_i32_0 = arith.constant 0 : i32
    %c0_i32_1 = arith.constant 0 : i32
    return %c0_i32, %c0_i32_0 : i32, i32
  }
  func.func @transform_12(%arg0: i32) -> (i32, i32) {
    %c0_i32 = arith.constant 0 : i32
    %c0_i32_0 = arith.constant 0 : i32
    %c0_i32_1 = arith.constant 0 : i32
    return %c0_i32, %c0_i32_0 : i32, i32
  }
  func.func @transform_13(%arg0: i32) -> (i32, i32) {
    %c0_i32 = arith.constant 0 : i32
    %c0_i32_0 = arith.constant 0 : i32
    %c0_i32_1 = arith.constant 0 : i32
    return %c0_i32, %c0_i32_0 : i32, i32
  }
  func.func @transform_14(%arg0: i32) -> (i32, i32) {
    %c0_i32 = arith.constant 0 : i32
    %c0_i32_0 = arith.constant 0 : i32
    %c0_i32_1 = arith.constant 0 : i32
    return %c0_i32, %c0_i32_0 : i32, i32
  }
  func.func @transform_15(%arg0: i32) -> (i32, i32) {
    %c0_i32 = arith.constant 0 : i32
    %c0_i32_0 = arith.constant 0 : i32
    %c0_i32_1 = arith.constant 0 : i32
    return %c0_i32, %c0_i32_0 : i32, i32
  }
  func.func @transform_16(%arg0: i32) -> (i32, i32) {
    %c0_i32 = arith.constant 0 : i32
    %c0_i32_0 = arith.constant 0 : i32
    %c0_i32_1 = arith.constant 0 : i32
    return %c0_i32, %c0_i32_0 : i32, i32
  }
  func.func @transform_17(%arg0: i32) -> (i32, i32) {
    %c0_i32 = arith.constant 0 : i32
    %c0_i32_0 = arith.constant 0 : i32
    %c0_i32_1 = arith.constant 0 : i32
    return %c0_i32, %c0_i32_0 : i32, i32
  }
  func.func @transform_18(%arg0: i32) -> (i32, i32) {
    %c0_i32 = arith.constant 0 : i32
    %c0_i32_0 = arith.constant 0 : i32
    %c0_i32_1 = arith.constant 0 : i32
    return %c0_i32, %c0_i32_0 : i32, i32
  }
  func.func @transform_19(%arg0: i32) -> (i32, i32) {
    %c0_i32 = arith.constant 0 : i32
    %c0_i32_0 = arith.constant 0 : i32
    %c0_i32_1 = arith.constant 0 : i32
    return %c0_i32, %c0_i32_0 : i32, i32
  }
  func.func @transform_20(%arg0: i32) -> (i32, i32) {
    %c0_i32 = arith.constant 0 : i32
    %c0_i32_0 = arith.constant 0 : i32
    %c0_i32_1 = arith.constant 0 : i32
    return %c0_i32, %c0_i32_0 : i32, i32
  }
  func.func @transform_21(%arg0: i32) -> (i32, i32) {
    %c0_i32 = arith.constant 0 : i32
    %c0_i32_0 = arith.constant 0 : i32
    %c0_i32_1 = arith.constant 0 : i32
    return %c0_i32, %c0_i32_0 : i32, i32
  }
  func.func @transform_22(%arg0: i32) -> (i32, i32) {
    %c0_i32 = arith.constant 0 : i32
    %c0_i32_0 = arith.constant 0 : i32
    %c0_i32_1 = arith.constant 0 : i32
    return %c0_i32, %c0_i32_0 : i32, i32
  }
  func.func @transform_23(%arg0: i32) -> (i32, i32) {
    %c0_i32 = arith.constant 0 : i32
    %c0_i32_0 = arith.constant 0 : i32
    %c0_i32_1 = arith.constant 0 : i32
    return %c0_i32, %c0_i32_0 : i32, i32
  }
  func.func @transform_24(%arg0: i32) -> (i32, i32, i32) {
    %c0_i32 = arith.constant 0 : i32
    %c0_i32_0 = arith.constant 0 : i32
    %c0_i32_1 = arith.constant 0 : i32
    return %arg0, %c0_i32, %c0_i32_0 : i32, i32, i32
  }
}

</mosaic_0001>

<bundles_post_ra>
// kernel: model_logits_forward.1
= control target key start
LH: loop header
LB: loop body
LE: loop exit
PB: predicated region body
PF: predicated region fallthrough
CT: control target
= control target key end

     0   :  { %s3175_s0 = inlined_call_operand.vmem [shape: bf16[2,8,32], index: 0, kind: input, shape index: {}]   ;;  %s3176_s1 = inlined_call_operand.vmem [shape: bf16[1,32], index: 1, kind: input, shape index: {}]   ;;  %s3177_s2 = inlined_call_operand.vmem [shape: bf16[1,32], index: 2, kind: input, shape index: {}]   ;;  %s3178_s3 = inlined_call_operand.vmem [shape: bf16[32,96], index: 3, kind: input, shape index: {}]   ;;  %s3179_s4 = inlined_call_operand.vmem [shape: bf16[32,32], index: 4, kind: input, shape index: {}]   ;;  %s3180_s5 = inlined_call_operand.vmem [shape: bf16[1,32], index: 5, kind: input, shape index: {}]   ;;  %s3181_s6 = inlined_call_operand.vmem [shape: bf16[1,32], index: 6, kind: input, shape index: {}]   ;;  %s3182_s7 = inlined_call_operand.vmem [shape: bf16[32,128], index: 7, kind: input, shape index: {}]   ;;  %s3183_s8 = inlined_call_operand.vmem [shape: bf16[1,128], index: 8, kind: input, shape index: {}]   ;;  %s3184_s9 = inlined_call_operand.vmem [shape: bf16[128,32], index: 9, kind: input, shape index: {}]   ;;  %s3185_s10 = inlined_call_operand.vmem [shape: bf16[1,32], index: 10, kind: input, shape index: {}]   ;;  %s3186_s11 = inlined_call_operand.vmem [shape: bf16[1,32], index: 11, kind: input, shape index: {}]   ;;  %s3187_s12 = inlined_call_operand.vmem [shape: bf16[1,32], index: 12, kind: input, shape index: {}]   ;;  %s3188_s13 = inlined_call_operand.vmem [shape: bf16[32,96], index: 13, kind: input, shape index: {}]   ;;  %s3189_s14 = inlined_call_operand.vmem [shape: bf16[32,32], index: 14, kind: input, shape index: {}]   ;;  %s3190_s15 = inlined_call_operand.vmem [shape: bf16[1,32], index: 15, kind: input, shape index: {}]   ;;  %s3191_s16 = inlined_call_operand.vmem [shape: bf16[1,32], index: 16, kind: input, shape index: {}]   ;;  %s3192_s17 = inlined_call_operand.vmem [shape: bf16[32,128], index: 17, kind: input, shape index: {}]   ;;  %s3193_s18 = inlined_call_operand.vmem [shape: bf16[1,128], index: 18, kind: input, shape index: {}]   ;;  %s3194_s19 = inlined_call_operand.vmem [shape: bf16[128,32], index: 19, kind: input, shape index: {}]   ;;  %s3195_s20 = inlined_call_operand.vmem [shape: bf16[1,32], index: 20, kind: input, shape index: {}]   ;;  %s3196_s21 = inlined_call_operand.vmem [shape: bf16[1,32], index: 21, kind: input, shape index: {}]   ;;  %s3197_s22 = inlined_call_operand.vmem [shape: bf16[1,32], index: 22, kind: input, shape index: {}]   ;;  %s3198_s23 = inlined_call_operand.vmem [shape: bf16[32,256], index: 23, kind: input, shape index: {}]   ;;  %s3199_s24 = inlined_call_operand.hbm [shape: bf16[2,8,256], index: 24, kind: output, shape index: {}]  }
   0x1   :  { %3213 = sst [smem:[#allocation8_spill]] %s3175_s0 }
   0x2   :  { %3214 = sst [smem:[#allocation9_spill]] %s3176_s1 }
   0x3   :  { %3215 = sst [smem:[#allocation10_spill]] %s3177_s2 }
   0x4   :  { %3216 = sst [smem:[#allocation11_spill]] %s3178_s3 }
   0x5   :  { %3217 = sst [smem:[#allocation12_spill]] %s3179_s4 }
   0x6   :  { %3218 = sst [smem:[#allocation13_spill]] %s3180_s5 }
   0x7   :  { %3219 = sst [smem:[#allocation14_spill]] %s3181_s6 }
   0x8   :  { %3220 = sst [smem:[#allocation15_spill]] %s3182_s7 }
   0x9   :  { %3221 = sst [smem:[#allocation16_spill]] %s3183_s8 }
   0xa   :  { %3222 = sst [smem:[#allocation17_spill]] %s3184_s9 }
   0xb   :  { %3223 = sst [smem:[#allocation18_spill]] %s3185_s10 }
   0xc   :  { %3224 = sst [smem:[#allocation19_spill]] %s3186_s11 }
   0xd   :  { %29 = vsyncpa [#allocation3], 0 }
   0xe   :  { %31 = vsyncpa [#allocation3 + $0x1], 0  ;;  %s2757_s5 = smov 0   ;;  %s2759_s26 = smov 0  }
   0xf   :  { %s2761_s27 = smov 0   ;;  %s2763_s28 = smov 0  }
  0x10 LB: > { %3225 = sst [smem:[#allocation5_spill]] %s2617_s27  ;;  %s2778_s6 = sadd.s32 4294967295, %s2621_s28   ;;  %s2621_s28 = sphi %s2763_s28, %s3248_s28   ;;  %s2617_s27 = sphi %s2761_s27, %s3250_s27   ;;  %s2613_s26 = sphi %s2759_s26, %s3252_s26   ;;  %s2609_s5 = sphi %s2757_s5, %s3251_s5  }
  0x11   : > { %s2187_s2 = sadd.s32 4294967294, %s2621_s28   ;;  %s2782_s29 = sadd.s32 1, %s2621_s28  }
  0x12   : > { %3226 = sst [smem:[#allocation6_spill]] %s2782_s29  ;;  %s553_s0 = sadd.s32 1, %s2617_s27 }
  0x13   : > { %s550_s7 = ssub.s32 %s2621_s28, %s2782_s29  ;;  %p563_p0 = scmp.ne.s32.totalorder %s2617_s27, %s2613_s26 }
  0x14   : > { %p551_p1 = scmp.eq.s32.totalorder %s550_s7, 0  ;;  %p564_p2 = scmp.eq.s32.totalorder %s2778_s6, 1 }
  0x15   : > { %p569_p3 = scmp.ne.s32.totalorder %s2613_s26, %s2609_s5  ;;  %p570_p4 = scmp.eq.s32.totalorder %s2187_s2, 1 }
  0x16   : > { %s2793_s30 = scalar_select %p551_p1, %s2617_s27, %s553_s0  }
  0x17   : > { %p2795_p5 = por %p564_p2, %p563_p0  ;;  %p2799_p6 = por %p570_p4, %p569_p3 }
  0x18   : > { %3227 = sst [smem:[#allocation7_spill]] %s2793_s30  ;;  %p2190_p7 = scmp.ge.s32.totalorder %s2621_s28, 1 }
  0x19   : > { %p664_p8 = scmp.lt.s32.totalorder %s2621_s28, 3 }
  0x1b   : > { %p665_p9 = pnand %p2190_p7, %p664_p8 }
  0x1c   : > { %p729_p10 = scmp.lt.s32.totalorder (!%p665_p9), %s2778_s6, 1  ;;  %vm781_vm0 = vcmask (!%p665_p9), 261120   ;;  %s3230_s0 = sld [smem:[#allocation8_spill]] (!%p665_p9)  ;;  %v2623_v9 = vmov (!%p665_p9), 0.0   ;;  %vm2624_vm1 = vmmov (!%p665_p9), 0   ;;  %v736_v13 = vlaneseq (!%p665_p9) }
  0x1d   : > { %668 = sbr.rel (%p665_p9) target bundleno = 5905 (0x1711), region = 116  ;;  %s3231_s27 = sld [smem:[#allocation11_spill]] (!%p665_p9)  ;;  %2304 = vmatprep.subr.bf16.mxu1 (!%p665_p9), %v2623_v9  ;;  %2308 = vmatprep.mubr.msk.bf16.mxu1 (!%p665_p9), %vm2624_vm1, %v2623_v9  ;;  %vm866_vm2 = vcmask (!%p665_p9), 130048   ;;  %vm915_vm4 = vcmask (!%p665_p9), 64512   ;;  %vm933_vm5 = vcmask (!%p665_p9), 1043456  }
  0x1e   : > { %2318 = vmatprep.subr.bf16.mxu0 (!%p665_p9), %v2623_v9  ;;  %2320 = vmatprep.mubr.msk.bf16.mxu0 (!%p665_p9), %vm2624_vm1, %v2623_v9  ;;  %v2830_v15 = vshrl.u32 (!%p665_p9), %v736_v13, 7  ;;  %s3233_s2 = sld [smem:[#allocation9_spill]] (!%p665_p9)  ;;  %s3210_s1 = smov (!%p665_p9), 96   ;;  %v2859_v38 = vand.u32 (!%p665_p9), 127, %v736_v13 }
  0x1f   : > { %s3206_s30 = smov (!%p665_p9), 48   ;;  %s3237_s9 = sld [smem:[#allocation17_spill]] (!%p665_p9) }
  0x20   : > { %v2839_v19 = vsub.s32 (!%p665_p9), 0, %v2830_v15  ;;  %vm740_vm3 = vcmp.le.s32.totalorder (!%p665_p9), %v2859_v38, %v2830_v15  ;;  %s3241_s10 = sld [smem:[#allocation18_spill]] (!%p665_p9)  ;;  %s3242_s11 = sld [smem:[#allocation19_spill]] (!%p665_p9)  ;;  %v2512_v15 = vld [vmem:[%s3189_s14 + $0x8] sm:$0xff] (!%p665_p9)  }
  0x23   : > { %s3232_s29 = smov (!%p665_p9), %s3231_s27  ;;  %v2495_v8 = vld [vmem:[%s3231_s27] sm:$0xff] (!%p665_p9)   ;;  %s3209_s27 = smov (!%p665_p9), 80  }
  0x24   : > { %s730_s8 = scalar_select %p729_p10, %s2778_s6, 1  ;;  %2305 = vmatpush3.bf16.msra.mxu1 %v2495_v8  ;;  %v2496_v10 = vld [vmem:[%s3232_s29 + $0x8] sm:$0xff]   ;;  %v741_v16 = vld [vmem:[%s3233_s2] sm:$0x1] }
  0x25   : > { %2306 = vmatprep.subr.bf16.mxu1 %v2623_v9  ;;  %v742_v18 = vunpack.c.l.bf16 %v741_v16  ;;  %s3207_s2 = smov 64  }
  0x26   : > { %s2192_s4 = sshll.u32 %s730_s8, 2  ;;  %s3234_s8 = sld [smem:[#allocation10_spill]] }
  0x27   : > { %s732_s7 = scalar_lea.vmem %s3230_s0, %s2192_s4  ;;  %v799_v21 = vrot.slane %v742_v18, %v2839_v19  ;;  %s3208_s4 = smov 112  }
  0x28   : > { %v734_v0 = vld [vmem:[%s732_s7] sm:$0xf]  ;;  %2307 = vmatpush3.bf16.msra.mxu1 %v2496_v10  ;;  %s3236_s0 = sld [smem:[#allocation15_spill]]  ;;  %s3247_s7 = smov 48  }
  0x29   : > { %v2810_v1 = vunpack.c.l.bf16 %v734_v0  ;;  %2312 = vmatprep.subr.bf16.mxu1 %v2623_v9 }
  0x2b   : > { %v782_v2 = vsel %vm781_vm0, %v2810_v1, 0.0 }
  0x2c   : > { %783 = vadd.xlane.f32.xlu0 %v782_v2  ;;  %v743_v17 = vld [vmem:[%s3234_s8] sm:$0x1]  ;;  %s3235_s8 = sld [smem:[#allocation12_spill]] }
  0x2d   : > { %v744_v20 = vunpack.c.l.bf16 %v743_v17 }
  0x2f   : > { %v804_v24 = vrot.slane %v744_v20, %v2839_v19 }
  0x32   : > { %v2497_v13 = vld [vmem:[%s3235_s8] sm:$0xff]  }
  0xb9   : > { %v784_v3 = vpop.xlane.xlu0 %783 }
  0xba   : > { %v786_v4 = vmul.f32 0.03125, %v784_v3 }
  0xbc   : > { %v787_v5 = vsub.f32 %v2810_v1, %v786_v4 }
  0xbe   : > { %v788_v6 = vmul.f32 %v787_v5, %v787_v5 }
  0xc0   : > { %v789_v7 = vsel %vm781_vm0, %v788_v6, 0.0 }
  0xc1   : > { %790 = vadd.xlane.f32.xlu0 %v789_v7 }
 0x14e   : > { %v791_v11 = vpop.xlane.xlu0 %790 }
 0x14f   : > { %v792_v12 = vmul.f32 0.03125, %v791_v11 }
 0x151   : > { %v793_v14 = vadd.f32 1e-05, %v792_v12 }
 0x153   : > { %2529 = vrsqrt.f32 %v793_v14  ;;  %v2498_v14 = vld [vmem:[%s3235_s8 + $0x8] sm:$0xff]   ;;  %s3239_s8 = sld [smem:[#allocation14_spill]] }
 0x15d   : > { %v2530_v22 = vpop.eup %2529 }
 0x15e   : > { %v795_v23 = vmul.f32 %v2530_v22, %v787_v5 }
 0x160   : > { %v800_v25 = vmul.f32 %v799_v21, %v795_v23 }
 0x162   : > { %v805_v26 = vadd.f32 %v804_v24, %v800_v25 }
 0x164   : > { %v806_v27 = vpack.c.bf16 %v805_v26, %v805_v26 }
 0x166   : > { %2309 = vmatmul.mubr.msk.bf16.vlgmr.msra.gmra.mrb[0].mxu1 %vm781_vm0, %v806_v27 }
 0x167   : > { %2314 = vmatprep.mubr.msk.bf16.mxu1 %vm2624_vm1, %v2623_v9 }
 0x239   : > { %v856_v28 = vpop.f32.mrb[0].mxu1 }
 0x23a   : > { %v862_v29 = vpack.c.bf16 %v856_v28, %v856_v28  ;;  %v2310_v30 = vpop.f32.mrb[1].mxu1 }
 0x23b   : > { %v859_v31 = vpop.f32.mrb[2].mxu1 }
 0x23c   : > { %978 = vrot.lane.b32.xlu0 %v862_v29, %s3208_s4  ;;  %864 = vrot.lane.b32.xlu1 %v862_v29, %s3210_s1  ;;  %v2311_v32 = vpop.f32.mrb[3].mxu1  ;;  %s3238_s4 = sld [smem:[#allocation13_spill]]  ;;  %s3240_s1 = sld [smem:[#allocation16_spill]] }
 0x240   : > { %980 = vrot.lane.b32.xlu1 %v862_v29, %s3209_s27 }
 0x2ae   : > { %v865_v33 = vpop.permute.xlu1 %864  ;;  %v979_v37 = vpop.permute.xlu0 %978 }
 0x2af   : > { %v871_v34 = vsel %vm866_vm2, %v865_v33, 0 }
 0x2b0   : > { %2313 = vmatpush3.bf16.xpose.msra.mxu1 %v871_v34 }
 0x2b1   : > { %2324 = vmatprep.subr.bf16.mxu1 %v2623_v9 }
 0x2b2   : > { %v981_v35 = vpop.permute.xlu1 %980 }
 0x2b3   : > { %v986_v36 = vsel %vm866_vm2, %v981_v35, 0 }
 0x2b7   : > { %2315 = vmatmul.mubr.msk.bf16.vlgmr.msra.gmra.mrb[4].mxu1 %vm866_vm2, %v862_v29 }
 0x2b8   : > { %2325 = vmatpush3.bf16.xpose.msra.mxu1 %v986_v36  ;;  %2326 = vmatprep.mubr.msk.bf16.mxu1 %vm2624_vm1, %v2623_v9 }
 0x2b9   : > { %2336 = vmatprep.subr.bf16.mxu1 %v2623_v9 }
 0x2bf   : > { %2327 = vmatmul.mubr.msk.bf16.vlgmr.msra.gmra.mrb[8].mxu1 %vm866_vm2, %v979_v37 }
 0x2c0   : > { %2338 = vmatprep.mubr.msk.bf16.mxu1 %vm2624_vm1, %v2623_v9  ;;  %2337 = vmatpush3.bf16.msra.mxu1 %v2498_v14 }
 0x2c1   : > { %2348 = vmatprep.subr.bf16.mxu1 %v2623_v9 }
 0x38a   : > { %v907_v39 = vpop.f32.mrb[4].mxu1 }
 0x38b   : > { %v913_v40 = vmul.f32 0.25, %v907_v39  ;;  %v2316_v41 = vpop.f32.mrb[5].mxu1 }
 0x38c   : > { %v910_v42 = vpop.f32.mrb[6].mxu1 }
 0x38d   : > { %v2317_v43 = vpop.f32.mrb[7].mxu1  ;;  %v914_v44 = vsel %vm740_vm3, %v913_v40, -1e+30 }
 0x38e   : > { %v916_v45 = vsel %vm915_vm4, %v914_v44, -inf }
 0x38f   : > { %917 = vmax.xlane.f32.xlu1 %v916_v45  ;;  %v2501_v45 = vld [vmem:[%s3237_s9] sm:$0xff]  }
 0x392   : > { %v1022_v46 = vpop.f32.mrb[8].mxu1 }
 0x393   : > { %v1028_v47 = vmul.f32 0.25, %v1022_v46  ;;  %v2328_v48 = vpop.f32.mrb[9].mxu1 }
 0x394   : > { %v1025_v49 = vpop.f32.mrb[10].mxu1 }
 0x395   : > { %v2329_v50 = vpop.f32.mrb[11].mxu1  ;;  %v1029_v51 = vsel %vm740_vm3, %v1028_v47, -1e+30  ;;  %v753_v49 = vld [vmem:[%s3238_s4] sm:$0x1]  ;;  %s3246_s4 = smov 64  }
 0x396   : > { %v1030_v52 = vsel %vm915_vm4, %v1029_v51, -inf  ;;  %v755_v50 = vld [vmem:[%s3239_s8] sm:$0x1] }
 0x397   : > { %1031 = vmax.xlane.f32.xlu0 %v1030_v52  ;;  %v756_v52 = vunpack.c.l.bf16 %v755_v50 }
 0x3ad   : > { %1042 = vrot.lane.b32.xlu0 %v862_v29, %s3206_s30  ;;  %s3244_s30 = smov 80  }
 0x41c   : > { %v918_v53 = vpop.xlane.xlu1 %917 }
 0x41d   : > { %v919_v54 = vsub.f32 %v914_v44, %v918_v53  ;;  %v2499_v44 = vld [vmem:[%s3236_s0] sm:$0xff]  }
 0x41f   : > { %v920_v55 = vmul.f32 1.442695, %v919_v54 }
 0x421   : > { %2531 = vpow2.f32 %v920_v55 }
 0x424   : > { %v1032_v56 = vpop.xlane.xlu0 %1031 }
 0x425   : > { %v1033_v57 = vsub.f32 %v1029_v51, %v1032_v56  ;;  %v754_v51 = vunpack.c.l.bf16 %v753_v49  ;;  %v1211_v56 = vrot.slane %v756_v52, %v2839_v19 }
 0x427   : > { %v1034_v58 = vmul.f32 1.442695, %v1033_v57  ;;  %v1206_v53 = vrot.slane %v754_v51, %v2839_v19 }
 0x428   : > { %v1043_v6 = vpop.permute.xlu0 %1042 }
 0x429   : > { %2533 = vpow2.f32 %v1034_v58  ;;  %v1048_v8 = vsel %vm933_vm5, %v1043_v6, 0 }
 0x42b   : > { %v2532_v59 = vpop.eup %2531 }
 0x42c   : > { %v922_v60 = vsel %vm915_vm4, %v2532_v59, 0.0 }
 0x42d   : > { %923 = vadd.xlane.f32.xlu1 %v922_v60  ;;  %v2502_v60 = vld [vmem:[%s3237_s9 + $0x8] sm:$0xff]  }
 0x433   : > { %v2534_v61 = vpop.eup %2533 }
 0x434   : > { %v1036_v62 = vsel %vm915_vm4, %v2534_v61, 0.0 }
 0x435   : > { %1037 = vadd.xlane.f32.xlu1 %v1036_v62  ;;  %v2504_v62 = vld [vmem:[%s3237_s9 + $0x18] sm:$0xff]  }
 0x446   : > { %928 = vrot.lane.b32.xlu1 %v862_v29, %s3207_s2  ;;  %s3245_s2 = smov 112  }
 0x4ba   : > { %v924_v63 = vpop.xlane.xlu1 %923 }
 0x4bb   : > { %2535 = vrcp.f32 %v924_v63  ;;  %v2505_v63 = vld [vmem:[%s3237_s9 + $0x20] sm:$0xff]  }
 0x4c2   : > { %v1038_v0 = vpop.xlane.xlu1 %1037 }
 0x4c3   : > { %2537 = vrcp.f32 %v1038_v0  ;;  %v2506_v0 = vld [vmem:[%s3237_s9 + $0x28] sm:$0xff]  }
 0x4c5   : > { %v2536_v2 = vpop.eup %2535 }
 0x4c6   : > { %v929_v3 = vpop.permute.xlu1 %928  ;;  %v926_v4 = vmul.f32 %v2536_v2, %v2532_v59  ;;  %v2507_v2 = vld [vmem:[%s3237_s9 + $0x30] sm:$0xff]  }
 0x4c7   : > { %v935_v5 = vsel %vm933_vm5, %v929_v3, 0  ;;  %v2508_v3 = vld [vmem:[%s3237_s9 + $0x38] sm:$0xff]  }
 0x4c8   : > { %2319 = vmatpush3.bf16.msra.mxu0 %v935_v5  ;;  %v927_v7 = vpack.c.bf16 %v926_v4, %v926_v4  ;;  %v761_v4 = vld [vmem:[%s3240_s1] sm:$0x1] }
 0x4c9   : > { %2330 = vmatprep.subr.bf16.mxu0 %v2623_v9  ;;  %v762_v5 = vunpack.c.l.bf16 %v761_v4 }
 0x4cb   : > { %2321 = vmatmul.mubr.msk.bf16.vlgmr.msra.gmra.mrb[0].mxu0 %vm915_vm4, %v927_v7  ;;  %v1217_v6 = vrot.slane %v762_v5, %v2839_v19 }
 0x4cc   : > { %2331 = vmatpush3.bf16.msra.mxu0 %v1048_v8  ;;  %2332 = vmatprep.mubr.msk.bf16.mxu0 %vm2624_vm1, %v2623_v9 }
 0x4cd   : > { %v2538_v10 = vpop.eup %2537  ;;  %2342 = vmatprep.subr.bf16.mxu0 %v2623_v9 }
 0x4ce   : > { %v1040_v11 = vmul.f32 %v2538_v10, %v2534_v61  ;;  %v2503_v61 = vld [vmem:[%s3237_s9 + $0x10] sm:$0xff]  }
 0x4d0   : > { %v1041_v12 = vpack.c.bf16 %v1040_v11, %v1040_v11 }
 0x4d3   : > { %2333 = vmatmul.mubr.msk.bf16.vlgmr.msra.gmra.mrb[4].mxu0 %vm915_vm4, %v1041_v12 }
 0x4d4   : > { %2344 = vmatprep.mubr.msk.bf16.mxu0 %vm2624_vm1, %v2623_v9  ;;  %2343 = vmatpush3.bf16.msra.mxu0 %v2497_v13 }
 0x4d5   : > { %2356 = vmatprep.subr.bf16.mxu0 %v2623_v9 }
 0x59e   : > { %v971_v16 = vpop.f32.mrb[0].mxu0 }
 0x59f   : > { %v977_v17 = vpack.c.bf16 %v971_v16, %v971_v16  ;;  %v2322_v18 = vpop.f32.mrb[1].mxu0 }
 0x5a0   : > { %v974_v20 = vpop.f32.mrb[2].mxu0 }
 0x5a1   : > { %v2323_v21 = vpop.f32.mrb[3].mxu0  ;;  %2345 = vmatmul.mubr.msk.bf16.vlgmr.msra.gmra.mrb[8].mxu0 %vm866_vm2, %v977_v17 }
 0x5a2   : > { %2372 = vmatprep.mubr.msk.bf16.mxu0 %vm2624_vm1, %v2623_v9  ;;  %2357 = vmatpush3.bf16.msra.mxu0 %v2501_v45  ;;  %v1377_v45 = vld [vmem:[%s3242_s11] sm:$0x1] }
 0x5a3   : > { %2358 = vmatprep.subr.bf16.mxu0 %v2623_v9 }
 0x5a6   : > { %v1084_v22 = vpop.f32.mrb[4].mxu0  ;;  %2359 = vmatpush3.bf16.msra.mxu0 %v2502_v60 }
 0x5a7   : > { %v1090_v23 = vpack.c.bf16 %v1084_v22, %v1084_v22  ;;  %v2334_v24 = vpop.f32.mrb[5].mxu0  ;;  %2360 = vmatprep.subr.bf16.mxu0 %v2623_v9 }
 0x5a8   : > { %v1087_v25 = vpop.f32.mrb[6].mxu0 }
 0x5a9   : > { %v2335_v26 = vpop.f32.mrb[7].mxu0  ;;  %2339 = vmatmul.mubr.msk.bf16.vlgmr.msra.gmra.mrb[12].mxu1 %vm866_vm2, %v1090_v23  ;;  %v779_v25 = vld [vmem:[%s3241_s10] sm:$0x1] }
 0x5aa   : > { %2352 = vmatprep.mubr.msk.bf16.mxu1 %vm2624_vm1, %v2623_v9  ;;  %2349 = vmatpush3.bf16.msra.mxu1 %v2499_v44  ;;  %v780_v26 = vunpack.c.l.bf16 %v779_v25 }
 0x5ab   : > { %2350 = vmatprep.subr.bf16.mxu1 %v2623_v9  ;;  %2361 = vmatpush3.bf16.msra.mxu0 %v2503_v61 }
 0x5ac   : > { %2362 = vmatprep.subr.bf16.mxu0 %v2623_v9 }
 0x5af   : > { %2363 = vmatpush3.bf16.msra.mxu0 %v2504_v62 }
 0x5b0   : > { %2364 = vmatprep.subr.bf16.mxu0 %v2623_v9 }
 0x5b3   : > { %2365 = vmatpush3.bf16.msra.mxu0 %v2505_v63 }
 0x5b4   : > { %2366 = vmatprep.subr.bf16.mxu0 %v2623_v9 }
 0x5b7   : > { %2367 = vmatpush3.bf16.msra.mxu0 %v2506_v0 }
 0x5b8   : > { %2368 = vmatprep.subr.bf16.mxu0 %v2623_v9 }
 0x5bb   : > { %2369 = vmatpush3.bf16.msra.mxu0 %v2507_v2 }
 0x5bc   : > { %2370 = vmatprep.subr.bf16.mxu0 %v2623_v9 }
 0x5bf   : > { %2371 = vmatpush3.bf16.msra.mxu0 %v2508_v3 }
 0x5c0   : > { %2402 = vmatprep.subr.bf16.mxu0 %v2623_v9 }
 0x674   : > { %v1183_v27 = vpop.f32.mrb[8].mxu0 }
 0x675   : > { %v2346_v28 = vpop.f32.mrb[9].mxu0 }
 0x676   : > { %v1186_v29 = vpop.f32.mrb[10].mxu0 }
 0x677   : > { %v2347_v30 = vpop.f32.mrb[11].mxu0 }
 0x67c   : > { %v1134_v31 = vpop.f32.mrb[12].mxu1 }
 0x67d   : > { %v1184_v32 = vadd.f32 %v1183_v27, %v1134_v31  ;;  %v2340_v33 = vpop.f32.mrb[13].mxu1  ;;  %v1375_v27 = vrot.slane %v780_v26, %v2839_v19 }
 0x67e   : > { %v1137_v34 = vpop.f32.mrb[14].mxu1 }
 0x67f   : > { %v2900_v35 = vadd.f32 %v1184_v32, %v2810_v1  ;;  %v2341_v36 = vpop.f32.mrb[15].mxu1  ;;  %v2500_v1 = vld [vmem:[%s3236_s0 + $0x8] sm:$0xff]   ;;  %s3243_s0 = smov 96  }
 0x680   : > { %2351 = vmatpush3.bf16.msra.mxu1 %v2500_v1 }
 0x681   : > { %v1190_v37 = vsel %vm781_vm0, %v2900_v35, 0.0  ;;  %2376 = vmatprep.subr.bf16.mxu1 %v2623_v9 }
 0x682   : > { %1191 = vadd.xlane.f32.xlu1 %v1190_v37 }
 0x70f   : > { %v1192_v39 = vpop.xlane.xlu1 %1191 }
 0x710   : > { %v1193_v40 = vmul.f32 0.03125, %v1192_v39 }
 0x712   : > { %v1194_v41 = vsub.f32 %v2900_v35, %v1193_v40 }
 0x714   : > { %v1195_v42 = vmul.f32 %v1194_v41, %v1194_v41 }
 0x716   : > { %v1196_v43 = vsel %vm781_vm0, %v1195_v42, 0.0  ;;  %v2510_v42 = vld [vmem:[%s3188_s13 + $0x8] sm:$0xff]  }
 0x717   : > { %1197 = vadd.xlane.f32.xlu0 %v1196_v43 }
 0x7a4   : > { %v1198_v46 = vpop.xlane.xlu0 %1197 }
 0x7a5   : > { %v1199_v47 = vmul.f32 0.03125, %v1198_v46  ;;  %v1379_v46 = vld [vmem:[%s3187_s12] sm:$0x1] }
 0x7a7   : > { %v1200_v48 = vadd.f32 1e-05, %v1199_v47  ;;  %v1378_v47 = vunpack.c.l.bf16 %v1377_v45  ;;  %v2511_v45 = vld [vmem:[%s3189_s14] sm:$0xff]  }
 0x7a9   : > { %2539 = vrsqrt.f32 %v1200_v48  ;;  %v1380_v48 = vunpack.c.l.bf16 %v1379_v46  ;;  %v1433_v49 = vrot.slane %v1378_v47, %v2839_v19 }
 0x7ab   : > { %v1438_v52 = vrot.slane %v1380_v48, %v2839_v19 }
 0x7b3   : > { %v2540_v54 = vpop.eup %2539 }
 0x7b4   : > { %v1202_v55 = vmul.f32 %v2540_v54, %v1194_v41 }
 0x7b6   : > { %v1207_v57 = vmul.f32 %v1206_v53, %v1202_v55 }
 0x7b8   : > { %v1212_v58 = vadd.f32 %v1211_v56, %v1207_v57 }
 0x7ba   : > { %v1213_v59 = vpack.c.bf16 %v1212_v58, %v1212_v58 }
 0x7bc   : > { %2353 = vmatmul.mubr.msk.bf16.vlgmr.msra.gmra.mrb[16].mxu1 %vm781_vm0, %v1213_v59 }
 0x7bd   : > { %2380 = vmatprep.mubr.msk.bf16.mxu1 %vm2624_vm1, %v2623_v9 }
 0x88f   : > { %v1267_v7 = vpop.f32.mrb[16].mxu1 }
 0x890   : > { %v1268_v8 = vadd.f32 %v1267_v7, %v1217_v6  ;;  %v2354_v10 = vpop.f32.mrb[17].mxu1 }
 0x891   : > { %v1270_v11 = vpop.f32.mrb[18].mxu1 }
 0x892   : > { %v1274_v12 = vmul.f32 0.044715, %v1268_v8  ;;  %v2355_v13 = vpop.f32.mrb[19].mxu1  ;;  %v1273_v21 = vmul.f32 0.5, %v1268_v8 }
 0x894   : > { %v1275_v14 = vmul.f32 %v1274_v12, %v1268_v8 }
 0x896   : > { %v1276_v16 = vmul.f32 %v1275_v14, %v1268_v8 }
 0x898   : > { %v1277_v17 = vadd.f32 %v1276_v16, %v1268_v8 }
 0x89a   : > { %v1278_v18 = vmul.f32 0.7978846, %v1277_v17 }
 0x89c   : > { %2541 = vtanh.f32 %v1278_v18 }
 0x8a6   : > { %v2542_v20 = vpop.eup %2541 }
 0x8a7   : > { %v1280_v22 = vadd.f32 1.0, %v2542_v20 }
 0x8a9   : > { %v1281_v23 = vmul.f32 %v1280_v22, %v1273_v21 }
 0x8ab   : > { %v1282_v24 = vpack.c.bf16 %v1281_v23, %v1281_v23 }
 0x8ad   : > { %2373 = vmatmul.mubr.bf16.vlgmr.msra.gmra.mrb[12].mxu0 %v1282_v24 }
 0x8ae   : > { %2404 = vmatprep.mubr.msk.bf16.mxu0 %vm2624_vm1, %v2623_v9 }
 0x980   : > { %v1365_v28 = vpop.f32.mrb[12].mxu0 }
 0x981   : > { %v1371_v29 = vadd.f32 %v1365_v28, %v2900_v35  ;;  %v2374_v30 = vpop.f32.mrb[13].mxu0  ;;  %v2509_v35 = vld [vmem:[%s3188_s13] sm:$0xff]  }
 0x982   : > { %v1368_v31 = vpop.f32.mrb[14].mxu0  ;;  %2377 = vmatpush3.bf16.msra.mxu1 %v2509_v35 }
 0x983   : > { %v2968_v32 = vadd.f32 %v1375_v27, %v1371_v29  ;;  %v2375_v33 = vpop.f32.mrb[15].mxu0  ;;  %2378 = vmatprep.subr.bf16.mxu1 %v2623_v9 }
 0x985   : > { %v1417_v34 = vsel %vm781_vm0, %v2968_v32, 0.0 }
 0x986   : > { %1418 = vadd.xlane.f32.xlu1 %v1417_v34  ;;  %2379 = vmatpush3.bf16.msra.mxu1 %v2510_v42 }
 0x987   : > { %2384 = vmatprep.subr.bf16.mxu1 %v2623_v9 }
 0xa13   : > { %v1419_v36 = vpop.xlane.xlu1 %1418 }
 0xa14   : > { %v1420_v37 = vmul.f32 0.03125, %v1419_v36 }
 0xa16   : > { %v1421_v39 = vsub.f32 %v2968_v32, %v1420_v37 }
 0xa18   : > { %v1422_v40 = vmul.f32 %v1421_v39, %v1421_v39 }
 0xa1a   : > { %v1423_v41 = vsel %vm781_vm0, %v1422_v40, 0.0 }
 0xa1b   : > { %1424 = vadd.xlane.f32.xlu1 %v1423_v41 }
 0xaa8   : > { %v1425_v43 = vpop.xlane.xlu1 %1424 }
 0xaa9   : > { %v1426_v44 = vmul.f32 0.03125, %v1425_v43 }
 0xaab   : > { %v1427_v1 = vadd.f32 1e-05, %v1426_v44 }
 0xaad   : > { %2543 = vrsqrt.f32 %v1427_v1 }
 0xab7   : > { %v2544_v50 = vpop.eup %2543 }
 0xab8   : > { %v1429_v51 = vmul.f32 %v2544_v50, %v1421_v39 }
 0xaba   : > { %v1434_v53 = vmul.f32 %v1433_v49, %v1429_v51 }
 0xabc   : > { %v1439_v54 = vadd.f32 %v1438_v52, %v1434_v53 }
 0xabe   : > { %v1440_v55 = vpack.c.bf16 %v1439_v54, %v1439_v54 }
 0xac0   : > { %2381 = vmatmul.mubr.msk.bf16.vlgmr.msra.gmra.mrb[20].mxu1 %vm781_vm0, %v1440_v55 }
 0xac1   : > { %2386 = vmatprep.mubr.msk.bf16.mxu1 %vm2624_vm1, %v2623_v9 }
 0xb93   : > { %v1490_v56 = vpop.f32.mrb[20].mxu1 }
 0xb94   : > { %v1496_v57 = vpack.c.bf16 %v1490_v56, %v1490_v56  ;;  %v2382_v58 = vpop.f32.mrb[21].mxu1 }
 0xb95   : > { %v1493_v59 = vpop.f32.mrb[22].mxu1 }
 0xb96   : > { %1498 = vrot.lane.b32.xlu1 %v1496_v57, %s3243_s0  ;;  %v2383_v60 = vpop.f32.mrb[23].mxu1 }
 0xb9a   : > { %1611 = vrot.lane.b32.xlu1 %v1496_v57, %s3244_s30  ;;  %s726_s30 = sand.u32 1, %s2613_s26  }
 0xb9b   : > { %s2114_s9 = scalar_lea.sflag [#allocation3], %s726_s30 }
 0xb9e   : > { %1609 = vrot.lane.b32.xlu1 %v1496_v57, %s3245_s2  ;;  %s2191_s2 = sshll.u32 %s726_s30, 3 }
 0xc08   : > { %v1499_v61 = vpop.permute.xlu1 %1498 }
 0xc09   : > { %v1504_v62 = vsel %vm866_vm2, %v1499_v61, 0 }
 0xc0a   : > { %2385 = vmatpush3.bf16.xpose.msra.mxu1 %v1504_v62 }
 0xc0b   : > { %2390 = vmatprep.subr.bf16.mxu1 %v2623_v9 }
 0xc0c   : > { %v1612_v20 = vpop.permute.xlu1 %1611 }
 0xc0d   : > { %v1617_v22 = vsel %vm866_vm2, %v1612_v20, 0 }
 0xc10   : > { %v1610_v23 = vpop.permute.xlu1 %1609 }
 0xc11   : > { %2387 = vmatmul.mubr.msk.bf16.vlgmr.msra.gmra.mrb[24].mxu1 %vm866_vm2, %v1496_v57 }
 0xc12   : > { %2392 = vmatprep.mubr.msk.bf16.mxu1 %vm2624_vm1, %v2623_v9 }
 0xce4   : > { %v1540_v63 = vpop.f32.mrb[24].mxu1 }
 0xce5   : > { %v1546_v0 = vmul.f32 0.25, %v1540_v63  ;;  %v2388_v2 = vpop.f32.mrb[25].mxu1 }
 0xce6   : > { %v1543_v3 = vpop.f32.mrb[26].mxu1 }
 0xce7   : > { %v2389_v4 = vpop.f32.mrb[27].mxu1  ;;  %v1547_v5 = vsel %vm740_vm3, %v1546_v0, -1e+30 }
 0xce8   : > { %v1548_v6 = vsel %vm915_vm4, %v1547_v5, -inf }
 0xce9   : > { %1549 = vmax.xlane.f32.xlu0 %v1548_v6  ;;  %v2513_v6 = vld [vmem:[%s3192_s17] sm:$0xff]  }
 0xd76   : > { %v1550_v7 = vpop.xlane.xlu0 %1549 }
 0xd77   : > { %v1551_v8 = vsub.f32 %v1547_v5, %v1550_v7  ;;  %v2515_v7 = vld [vmem:[%s3194_s19] sm:$0xff]  }
 0xd79   : > { %v1552_v10 = vmul.f32 1.442695, %v1551_v8 }
 0xd7b   : > { %2545 = vpow2.f32 %v1552_v10 }
 0xd85   : > { %v2546_v11 = vpop.eup %2545 }
 0xd86   : > { %v1554_v12 = vsel %vm915_vm4, %v2546_v11, 0.0 }
 0xd87   : > { %1555 = vadd.xlane.f32.xlu0 %v1554_v12  ;;  %v1389_v12 = vld [vmem:[%s3190_s15] sm:$0x1] }
 0xd9d   : > { %1560 = vrot.lane.b32.xlu0 %v1496_v57, %s3246_s4  ;;  %s2249_s4 = sshll.u32 %s2778_s6, 7 }
 0xd9e   : > { %s3133_s0 = scalar_lea.hbm %s3199_s24, %s2249_s4 }
 0xe14   : > { %v1556_v13 = vpop.xlane.xlu0 %1555 }
 0xe15   : > { %2547 = vrcp.f32 %v1556_v13  ;;  %v1391_v13 = vld [vmem:[%s3191_s16] sm:$0x1] }
 0xe18   : > { %v1561_v14 = vpop.permute.xlu0 %1560 }
 0xe19   : > { %v1566_v16 = vsel %vm933_vm5, %v1561_v14, 0  ;;  %v1390_v14 = vunpack.c.l.bf16 %v1389_v12 }
 0xe1a   : > { %2391 = vmatpush3.bf16.msra.mxu1 %v1566_v16  ;;  %v1392_v16 = vunpack.c.l.bf16 %v1391_v13 }
 0xe1b   : > { %2396 = vmatprep.subr.bf16.mxu1 %v2623_v9 }
 0xe1f   : > { %v2548_v17 = vpop.eup %2547 }
 0xe20   : > { %v1558_v18 = vmul.f32 %v2548_v17, %v2546_v11  ;;  %v1837_v17 = vrot.slane %v1390_v14, %v2839_v19 }
 0xe22   : > { %v1559_v21 = vpack.c.bf16 %v1558_v18, %v1558_v18 }
 0xe24   : > { %2393 = vmatmul.mubr.msk.bf16.vlgmr.msra.gmra.mrb[28].mxu1 %vm915_vm4, %v1559_v21  ;;  %v1842_v21 = vrot.slane %v1392_v16, %v2839_v19 }
 0xe25   : > { %2397 = vmatpush3.bf16.xpose.msra.mxu1 %v1617_v22  ;;  %2398 = vmatprep.mubr.msk.bf16.mxu1 %vm2624_vm1, %v2623_v9 }
 0xe26   : > { %2408 = vmatprep.subr.bf16.mxu1 %v2623_v9 }
 0xe2c   : > { %2399 = vmatmul.mubr.msk.bf16.vlgmr.msra.gmra.mrb[32].mxu1 %vm866_vm2, %v1610_v23 }
 0xe2d   : > { %2410 = vmatprep.mubr.msk.bf16.mxu1 %vm2624_vm1, %v2623_v9  ;;  %2409 = vmatpush3.bf16.msra.mxu1 %v2512_v15 }
 0xe2e   : > { %2420 = vmatprep.subr.bf16.mxu1 %v2623_v9 }
 0xef7   : > { %v1602_v24 = vpop.f32.mrb[28].mxu1 }
 0xef8   : > { %v2394_v25 = vpop.f32.mrb[29].mxu1  ;;  %v1608_v47 = vpack.c.bf16 %v1602_v24, %v1602_v24 }
 0xef9   : > { %v1605_v26 = vpop.f32.mrb[30].mxu1  ;;  %v2516_v25 = vld [vmem:[%s3194_s19 + $0x8] sm:$0xff]  }
 0xefa   : > { %v2395_v27 = vpop.f32.mrb[31].mxu1  ;;  %v2517_v26 = vld [vmem:[%s3194_s19 + $0x10] sm:$0xff]  }
 0xefb   : > { %v2518_v27 = vld [vmem:[%s3194_s19 + $0x18] sm:$0xff]  }
 0xeff   : > { %v1653_v28 = vpop.f32.mrb[32].mxu1 }
 0xf00   : > { %v1659_v29 = vmul.f32 0.25, %v1653_v28  ;;  %v2400_v30 = vpop.f32.mrb[33].mxu1  ;;  %v2519_v28 = vld [vmem:[%s3194_s19 + $0x20] sm:$0xff]  }
 0xf01   : > { %v1656_v31 = vpop.f32.mrb[34].mxu1  ;;  %v2521_v30 = vld [vmem:[%s3194_s19 + $0x30] sm:$0xff]  }
 0xf02   : > { %v2401_v33 = vpop.f32.mrb[35].mxu1  ;;  %v1660_v34 = vsel %vm740_vm3, %v1659_v29, -1e+30  ;;  %v2520_v29 = vld [vmem:[%s3194_s19 + $0x28] sm:$0xff]   ;;  %v2522_v31 = vld [vmem:[%s3194_s19 + $0x38] sm:$0xff]  }
 0xf03   : > { %v1661_v36 = vsel %vm915_vm4, %v1660_v34, -inf  ;;  %v1397_v33 = vld [vmem:[%s3193_s18] sm:$0x1] }
 0xf04   : > { %1662 = vmax.xlane.f32.xlu1 %v1661_v36 }
 0xf15   : > { %1673 = vrot.lane.b32.xlu1 %v1496_v57, %s3247_s7  ;;  %s728_s7 = scalar_lea.vmem [#allocation2], %s2191_s2  ;;  %s2631_s2 = smov [#allocation2]  }
 0xf16   : > { %s2128_s1 = sshll.u32 %s728_s7, 4  ;;  %s2563_s10 = sshll.u32 %s2631_s2, 4  ;;  %s3135_s1 = int_to_ptr.vmem [resolvable:$true] %s2128_s1  ;;  %s2564_s10 = int_to_ptr.vmem [resolvable:$false] %s2563_s10 }
 0xf17   : > { %s2559_s6 = scalar_lea.vmem %s3135_s1, 128  ;;  %s2565_s11 = scalar_lea.vmem %s2564_s10, 256 }
 0xf18   : > { %p2560_p11 = scmp.ne.s32.totalorder %s3135_s1, %s2559_s6  ;;  %p2566_p0 = scmp.lt.s32.totalorder %s3135_s1, %s2564_s10 }
 0xf19   : > { %p2567_p1 = scmp.lt.s32.totalorder %s2565_s11, %s2559_s6 }
 0xf1a   : > { %p2561_p12 = pnand %p2560_p11, %p2795_p5 }
 0xf1b   : > { %p2568_p2 = por %p2567_p1, %p2566_p0 }
 0xf1c   : > { %p2562_p13 = pneg %p2561_p12 }
 0xf1e   : > { %p2569_p3 = pnand %p2568_p2, %p2562_p13 }
 0xf91   : > { %v1663_v37 = vpop.xlane.xlu1 %1662 }
 0xf92   : > { %v1664_v39 = vsub.f32 %v1660_v34, %v1663_v37  ;;  %v1398_v34 = vunpack.c.l.bf16 %v1397_v33 }
 0xf94   : > { %v1665_v40 = vmul.f32 1.442695, %v1664_v39  ;;  %v1848_v36 = vrot.slane %v1398_v34, %v2839_v19 }
 0xf95   : > { %v1674_v41 = vpop.permute.xlu1 %1673 }
 0xf96   : > { %2549 = vpow2.f32 %v1665_v40  ;;  %v1679_v35 = vsel %vm933_vm5, %v1674_v41, 0 }
 0xf97   : > { %2403 = vmatpush3.bf16.msra.mxu0 %v1679_v35 }
 0xf98   : > { %2414 = vmatprep.subr.bf16.mxu0 %v2623_v9 }
 0xfa0   : > { %v2550_v42 = vpop.eup %2549 }
 0xfa1   : > { %v1667_v43 = vsel %vm915_vm4, %v2550_v42, 0.0 }
 0xfa2   : > { %1668 = vadd.xlane.f32.xlu0 %v1667_v43 }
0x102f   : > { %v1669_v38 = vpop.xlane.xlu0 %1668 }
0x1030   : > { %2551 = vrcp.f32 %v1669_v38 }
0x103a   : > { %v2552_v44 = vpop.eup %2551 }
0x103b   : > { %v1671_v1 = vmul.f32 %v2552_v44, %v2550_v42 }
0x103d   : > { %v1672_v46 = vpack.c.bf16 %v1671_v1, %v1671_v1 }
0x103f   : > { %2405 = vmatmul.mubr.msk.bf16.vlgmr.msra.gmra.mrb[16].mxu0 %vm915_vm4, %v1672_v46 }
0x1040   : > { %2415 = vmatpush3.bf16.msra.mxu0 %v2511_v45  ;;  %2416 = vmatprep.mubr.msk.bf16.mxu0 %vm2624_vm1, %v2623_v9 }
0x1041   : > { %2428 = vmatprep.subr.bf16.mxu0 %v2623_v9 }
0x1047   : > { %2417 = vmatmul.mubr.msk.bf16.vlgmr.msra.gmra.mrb[20].mxu0 %vm866_vm2, %v1608_v47 }
0x1048   : > { %2444 = vmatprep.mubr.msk.bf16.mxu0 %vm2624_vm1, %v2623_v9  ;;  %2429 = vmatpush3.bf16.msra.mxu0 %v2515_v7  ;;  %v2008_v7 = vld [vmem:[%s3196_s21] sm:$0x1] }
0x1049   : > { %2430 = vmatprep.subr.bf16.mxu0 %v2623_v9 }
0x104c   : > { %2431 = vmatpush3.bf16.msra.mxu0 %v2516_v25 }
0x104d   : > { %2432 = vmatprep.subr.bf16.mxu0 %v2623_v9 }
0x1050   : > { %2433 = vmatpush3.bf16.msra.mxu0 %v2517_v26 }
0x1051   : > { %2434 = vmatprep.subr.bf16.mxu0 %v2623_v9 }
0x1054   : > { %2435 = vmatpush3.bf16.msra.mxu0 %v2518_v27 }
0x1055   : > { %2436 = vmatprep.subr.bf16.mxu0 %v2623_v9 }
0x1058   : > { %2437 = vmatpush3.bf16.msra.mxu0 %v2519_v28 }
0x1059   : > { %2438 = vmatprep.subr.bf16.mxu0 %v2623_v9 }
0x105c   : > { %2439 = vmatpush3.bf16.msra.mxu0 %v2520_v29 }
0x105d   : > { %2440 = vmatprep.subr.bf16.mxu0 %v2623_v9 }
0x1060   : > { %2441 = vmatpush3.bf16.msra.mxu0 %v2521_v30 }
0x1061   : > { %2442 = vmatprep.subr.bf16.mxu0 %v2623_v9 }
0x1064   : > { %2443 = vmatpush3.bf16.msra.mxu0 %v2522_v31 }
0x1112   : > { %v1715_v48 = vpop.f32.mrb[16].mxu0 }
0x1113   : > { %v1721_v49 = vpack.c.bf16 %v1715_v48, %v1715_v48  ;;  %v2406_v50 = vpop.f32.mrb[17].mxu0  ;;  %v1415_v48 = vld [vmem:[%s3195_s20] sm:$0x1] }
0x1114   : > { %v1718_v51 = vpop.f32.mrb[18].mxu0 }
0x1115   : > { %v2407_v52 = vpop.f32.mrb[19].mxu0  ;;  %2411 = vmatmul.mubr.msk.bf16.vlgmr.msra.gmra.mrb[36].mxu1 %vm866_vm2, %v1721_v49  ;;  %v1416_v49 = vunpack.c.l.bf16 %v1415_v48 }
0x1116   : > { %2424 = vmatprep.mubr.msk.bf16.mxu1 %vm2624_vm1, %v2623_v9  ;;  %2421 = vmatpush3.bf16.msra.mxu1 %v2513_v6 }
0x1117   : > { %2422 = vmatprep.subr.bf16.mxu1 %v2623_v9  ;;  %v2006_v50 = vrot.slane %v1416_v49, %v2839_v19 }
0x111a   : > { %v1814_v53 = vpop.f32.mrb[20].mxu0 }
0x111b   : > { %v2418_v54 = vpop.f32.mrb[21].mxu0 }
0x111c   : > { %v1817_v55 = vpop.f32.mrb[22].mxu0 }
0x111d   : > { %v2419_v56 = vpop.f32.mrb[23].mxu0 }
0x11e8   : > { %v1765_v57 = vpop.f32.mrb[36].mxu1 }
0x11e9   : > { %v1815_v58 = vadd.f32 %v1814_v53, %v1765_v57  ;;  %v2412_v59 = vpop.f32.mrb[37].mxu1 }
0x11ea   : > { %v1768_v60 = vpop.f32.mrb[38].mxu1 }
0x11eb   : > { %v3043_v61 = vadd.f32 %v1815_v58, %v2968_v32  ;;  %v2413_v62 = vpop.f32.mrb[39].mxu1  ;;  %v2514_v32 = vld [vmem:[%s3192_s17 + $0x8] sm:$0xff]  }
0x11ec   : > { %2423 = vmatpush3.bf16.msra.mxu1 %v2514_v32 }
0x11ed   : > { %v1821_v63 = vsel %vm781_vm0, %v3043_v61, 0.0 }
0x11ee   : > { %1822 = vadd.xlane.f32.xlu0 %v1821_v63 }
0x127b   : > { %v1823_v0 = vpop.xlane.xlu0 %1822 }
0x127c   : > { %v1824_v2 = vmul.f32 0.03125, %v1823_v0  ;;  %v2525_v0 = vld [vmem:[%s3198_s23 + $0x4] ss:$8 sps:$4 sm:$0xff]  }
0x127d   : > { %2063 = vmatprep.subr.bf16.mxu1 %v2525_v0 }
0x127e   : > { %v1825_v3 = vsub.f32 %v3043_v61, %v1824_v2  ;;  %v2526_v2 = vld [vmem:[%s3198_s23 + $0x10] ss:$8 sps:$4 sm:$0xff]  }
0x1280   : > { %v1826_v4 = vmul.f32 %v1825_v3, %v1825_v3 }
0x1282   : > { %v1827_v5 = vsel %vm781_vm0, %v1826_v4, 0.0  ;;  %v2630_v4 = vmov 0  }
0x1283   : > { %1828 = vadd.xlane.f32.xlu0 %v1827_v5 }
0x1310   : > { %v1829_v8 = vpop.xlane.xlu0 %1828 }
0x1311   : > { %v1830_v10 = vmul.f32 0.03125, %v1829_v8  ;;  %v2010_v8 = vld [vmem:[%s3197_s22] sm:$0x1] }
0x1313   : > { %v1831_v11 = vadd.f32 1e-05, %v1830_v10  ;;  %v2009_v10 = vunpack.c.l.bf16 %v2008_v7 }
0x1315   : > { %2553 = vrsqrt.f32 %v1831_v11  ;;  %v2011_v11 = vunpack.c.l.bf16 %v2010_v8  ;;  %v2032_v12 = vrot.slane %v2009_v10, %v2839_v19 }
0x1317   : > { %v2037_v16 = vrot.slane %v2011_v11, %v2839_v19 }
0x131f   : > { %v2554_v18 = vpop.eup %2553 }
0x1320   : > { %v1833_v20 = vmul.f32 %v2554_v18, %v1825_v3  ;;  %v2528_v3 = vld [vmem:[%s3198_s23 + $0x14] ss:$8 sps:$4 sm:$0xff]  }
0x1322   : > { %v1838_v22 = vmul.f32 %v1837_v17, %v1833_v20 }
0x1324   : > { %v1843_v23 = vadd.f32 %v1842_v21, %v1838_v22 }
0x1326   : > { %v1844_v24 = vpack.c.bf16 %v1843_v23, %v1843_v23 }
0x1328   : > { %2425 = vmatmul.mubr.msk.bf16.vlgmr.msra.gmra.mrb[40].mxu1 %vm781_vm0, %v1844_v24 }
0x1329   : > { %2095 = vmatprep.mubr.bf16.mxu1 %v2630_v4 }
0x13fb   : > { %v1898_v37 = vpop.f32.mrb[40].mxu1 }
0x13fc   : > { %v1899_v39 = vadd.f32 %v1898_v37, %v1848_v36  ;;  %v2426_v40 = vpop.f32.mrb[41].mxu1 }
0x13fd   : > { %v1901_v41 = vpop.f32.mrb[42].mxu1 }
0x13fe   : > { %v1905_v35 = vmul.f32 0.044715, %v1899_v39  ;;  %v2427_v42 = vpop.f32.mrb[43].mxu1  ;;  %v1904_v1 = vmul.f32 0.5, %v1899_v39 }
0x1400   : > { %v1906_v43 = vmul.f32 %v1905_v35, %v1899_v39 }
0x1402   : > { %v1907_v15 = vmul.f32 %v1906_v43, %v1899_v39 }
0x1404   : > { %v1908_v38 = vadd.f32 %v1907_v15, %v1899_v39 }
0x1406   : > { %v1909_v44 = vmul.f32 0.7978846, %v1908_v38 }
0x1408   : > { %2555 = vtanh.f32 %v1909_v44 }
0x1412   : > { %v2556_v9 = vpop.eup %2555 }
0x1413   : > { %v1911_v45 = vadd.f32 1.0, %v2556_v9 }
0x1415   : > { %v1912_v46 = vmul.f32 %v1911_v45, %v1904_v1 }
0x1417   : > { %v1913_v47 = vpack.c.bf16 %v1912_v46, %v1912_v46 }
0x1419   : > { %2445 = vmatmul.mubr.bf16.vlgmr.msra.gmra.mrb[24].mxu0 %v1913_v47 }
0x14ec   : > { %v1996_v51 = vpop.f32.mrb[24].mxu0 }
0x14ed   : > { %v2002_v52 = vadd.f32 %v1996_v51, %v3043_v61  ;;  %v2446_v53 = vpop.f32.mrb[25].mxu0  ;;  %v2523_v61 = vld [vmem:[%s3198_s23] ss:$8 sps:$4 sm:$0xff]  }
0x14ee   : > { %v1999_v54 = vpop.f32.mrb[26].mxu0  ;;  %2064 = vmatpush1.bf16.msra.mxu1 %v2523_v61 }
0x14ef   : > { %v2447_v55 = vpop.f32.mrb[27].mxu0  ;;  %v2007_v56 = vadd.f32 %v2006_v50, %v2002_v52  ;;  %2065 = vmatprep.subr.bf16.mxu1 %v2528_v3 }
0x14f1   : > { %v2016_v57 = vsel %vm781_vm0, %v2007_v56, 0.0 }
0x14f2   : > { %2017 = vadd.xlane.f32.xlu0 %v2016_v57  ;;  %2066 = vmatpush1.bf16.msra.mxu1 %v2526_v2 }
0x157f   : > { %v2018_v58 = vpop.xlane.xlu0 %2017 }
0x1580   : > { %v2019_v59 = vmul.f32 0.03125, %v2018_v58 }
0x1582   : > { %v2020_v60 = vsub.f32 %v2007_v56, %v2019_v59 }
0x1584   : > { %v2021_v62 = vmul.f32 %v2020_v60, %v2020_v60 }
0x1586   : > { %v2022_v63 = vsel %vm781_vm0, %v2021_v62, 0.0 }
0x1587   : > { %2023 = vadd.xlane.f32.xlu0 %v2022_v63 }
0x1614   : > { %v2024_v5 = vpop.xlane.xlu0 %2023 }
0x1615   : > { %v2025_v6 = vmul.f32 0.03125, %v2024_v5 }
0x1617   : > { %v2026_v32 = vadd.f32 1e-05, %v2025_v6 }
0x1619   : > { %2557 = vrsqrt.f32 %v2026_v32 }
0x1623   : > { %v2558_v13 = vpop.eup %2557 }
0x1624   : > { %v2028_v14 = vmul.f32 %v2558_v13, %v2020_v60 }
0x1626   : > { %v2033_v17 = vmul.f32 %v2032_v12, %v2028_v14 }
0x1628   : > { %v2038_v18 = vadd.f32 %v2037_v16, %v2033_v17 }
0x162a   : > { %v2039_v20 = vpack.c.bf16 %v2038_v18, %v2038_v18 }
0x162c   : > { %2241 = vmatmul.mubr.msk.bf16.vlgmr.msra.gmra.mrb[44].mxu1 %vm781_vm0, %v2039_v20 }
0x16ff   : > { %v2097_v21 = vpop.f32.mrb[44].mxu1 }
0x1700   : > { %v2099_v22 = vpop.f32.mrb[45].mxu1 }
0x1701   : > { %v2248_v23 = vpack.c.bf16 %v2099_v22, %v2097_v21  ;;  %v2101_v24 = vpop.f32.mrb[46].mxu1 }
0x1702   : > { %v2102_v19 = vpop.f32.mrb[47].mxu1 }
0x1703   : > { %2112 = vst [vmem:[%s728_s7] sm:$0xff] %v2248_v23 }
0x1704   : > { %2572 = shalt.err (!%p2569_p3)
}
0x1705   : > { %s2573_s30 = scalar_lea.hbm %s3133_s0, 128  ;;  %s2577_s27 = scalar_lea.hbm %s3199_s24, 256 }
0x1706   : > { %p2574_p4 = scmp.ne.s32.totalorder %s3133_s0, %s2573_s30  ;;  %p2578_p9 = scmp.lt.u32.totalorder %s3133_s0, %s3199_s24 }
0x1707   : > { %p2579_p10 = scmp.lt.u32.totalorder %s2577_s27, %s2573_s30  ;;  %p2581_p12 = scmp.lt.u32.totalorder %s2573_s30, %s3133_s0 }
0x1708   : > { %p2575_p7 = pnand %p2574_p4, %p2795_p5 }
0x1709   : > { %p2580_p11 = por %p2579_p10, %p2578_p9 }
0x170a   : > { %p2576_p8 = pneg %p2575_p7 }
0x170b   : > { %p2582_p13 = por %p2581_p12, %p2580_p11 }
0x170d   : > { %p2583_p0 = pnand %p2582_p13, %p2576_p8 }
0x170f   : > { %2586 = shalt.err (!%p2583_p0)
}
0x1710   : > { %2448 = dma.vmem_to_hbm [thread:$0]  (%p2795_p5), %s3135_s1, 128, %s3133_s0, %s2114_s9  }
0x1711 PF: > { %p2454_p1 = scmp.ge.s32.totalorder %s2621_s28, 2  ;;  %s2140_s11 = sand.u32 1, %s2609_s5  }
0x1712   : > { %s2141_s6 = scalar_lea.sflag [#allocation3], %s2140_s11 }
0x1713   : > { %p2451_p2 = pnand %p2454_p1, %p2799_p6 }
0x1715   : > { %2604 = dma.done.wait (!%p2451_p2), %s2141_s6, 128  }
0x1716   : > { %2606 = vsyncadd (!%p2451_p2), %s2141_s6, 4294967168  ;;  %s3248_s28 = sld [smem:[#allocation6_spill]]  ;;  %s3249_s2 = sld [smem:[#allocation5_spill]] }
0x1717   : > { %s3250_s27 = sld [smem:[#allocation7_spill]]  ;;  %s3251_s5 = smov %s2613_s26 }
0x171c   : > { %p34_p3 = scmp.ge.s32.totalorder %s3248_s28, 4   ;;  %s3252_s26 = smov %s3249_s2 }
0x171e   :  { %36 = sbr.rel (!%p34_p3) target bundleno = 16 (0x10), region = 151 }
0x1725   :  { %2146 = vsyncpa [#allocation3], 1 }
0x1726   :  { %2148 = vsyncpa [#allocation3 + $0x1], 1 }

</bundles_post_ra>
